<compile_context>
chip_gen: v6e
topology: v6e:2x2x1
jax: 0.10.0
libtpu: 0.0.40
codegen_flags: <defaults>
</compile_context>

<pallas_src>
import jax
import jax.numpy as jnp
from jax.experimental import pallas as pl
from jax.experimental.pallas import tpu as pltpu


# ----------------------------- Pallas kernel ------------------------------ #
def _lstm_fused_kernel(x_ref, h0_ref, c0_ref,
                       wih0_ref, whh0_ref, b0_ref,
                       wih1_ref, whh1_ref, b1_ref,
                       fcw_ref, fcb_ref,
                       out_ref, hc_ref,
                       gx_s, h1h_s):
    """Single invocation.
    x_ref: time-major, batch-padded, flattened (T*Bp, D).
    gx_s : (T*Bp, 4H) precomputed layer-0 input gates (hoisted).
    h1h_s: (T*Bp, H) layer-1 hidden history for the hoisted FC.
    out_ref: (T*Bp, O_pad) lane-dense output; hc_ref: (Bp, 4H) packed [h0|h1|c0|c1]."""
    TB = x_ref.shape[0]
    _, Bp, H = h0_ref.shape
    T = TB // Bp

    # ---- hoisted layer-0 input projection: one MXU call, no time dependence ----
    gx_s[...] = (jnp.dot(x_ref[...], wih0_ref[...],
                         preferred_element_type=jnp.float32)
                 + b0_ref[...])

    # Hoist weight loads and the bias broadcast out of the unrolled loop
    # (JAX does not CSE broadcast_in_dim inside unrolled loops).
    whh0 = whh0_ref[...]
    wih1 = wih1_ref[...]
    whh1 = whh1_ref[...]
    b1 = jnp.broadcast_to(b1_ref[...], (Bp, 4 * H))

    def gates_to_hc(g, c_prev):
        # Gate layout (i, f, o, g).  Apply both nonlinearities over the full 4H
        # (= one 128-lane vreg) and slice afterwards: EUP cost is per-vreg, and the
        # 32-lane extracts ride the free XLU slot.
        sg = jax.nn.sigmoid(g)
        tg = jnp.tanh(g)
        i = sg[:, 0 * H:1 * H]
        f = sg[:, 1 * H:2 * H]
        o = sg[:, 2 * H:3 * H]
        gg = tg[:, 3 * H:4 * H]
        c_new = f * c_prev + i * gg
        h_new = o * jnp.tanh(c_new)
        return h_new, c_new

    def layer0(t, h0, c0):
        row = pl.multiple_of(t * Bp, Bp)           # aligned (8,128) tile of gx_s
        g0 = gx_s[pl.ds(row, Bp), :] + jnp.dot(
            h0, whh0, preferred_element_type=jnp.float32)
        return gates_to_hc(g0, c0)

    def layer1(h_in, h1, c1):
        # Two independent matmuls (no concat); both off layer-0's critical path.
        g1 = (jnp.dot(h_in, wih1, preferred_element_type=jnp.float32)
              + jnp.dot(h1, whh1, preferred_element_type=jnp.float32)
              + b1)
        return gates_to_hc(g1, c1)

    # ---- wavefront recurrence --------------------------------------------------
    # Iteration k computes layer-0 for step k and layer-1 for step k-1; the two cells
    # are independent, so the LLO scheduler can interleave their MXU/EUP/VPU chains.
    h1_i, c1_i = h0_ref[1], c0_ref[1]

    # prologue: layer-0, step 0
    h0, c0 = layer0(0, h0_ref[0], c0_ref[0])

    def step(k, carry):
        h0, c0, h1, c1 = carry
        h0n, c0n = layer0(k, h0, c0)               # layer-0, step k
        h1n, c1n = layer1(h0, h1, c1)              # layer-1, step k-1 (uses carry h0)
        row = pl.multiple_of((k - 1) * Bp, Bp)
        h1h_s[pl.ds(row, Bp), :] = h1n
        return (h0n, c0n, h1n, c1n)

    h0f, c0f, h1p, c1p = jax.lax.fori_loop(
        1, T, step, (h0, c0, h1_i, c1_i), unroll=True)

    # epilogue: layer-1, step T-1
    h1f, c1f = layer1(h0f, h1p, c1p)
    h1h_s[pl.ds(pl.multiple_of((T - 1) * Bp, Bp), Bp), :] = h1f

    # ---- hoisted FC + tanh * 80: one matmul, one lane-dense (128-wide) store ----
    y = jnp.tanh(jnp.dot(h1h_s[...], fcw_ref[...],
                         preferred_element_type=jnp.float32)
                 + fcb_ref[...]) * 80.0
    out_ref[...] = y

    # Final hidden/cell states lane-packed into a single (Bp, 4H) store.
    hc_ref[...] = jnp.concatenate([h0f, h1f, c0f, c1f], axis=-1)


# ------------------------- weight packing (trace time) --------------------- #
def _reorder_ifgo_to_ifog(w):
    """PyTorch gate order (i, f, g, o) -> kernel order (i, f, o, g) along axis 0."""
    H = w.shape[0] // 4
    return jnp.concatenate([w[0 * H:2 * H], w[3 * H:4 * H], w[2 * H:3 * H]], axis=0)


def pack_params(pt):
    """Pre-transpose / reorder / pad PyTorch-layout LSTM + FC weights for the kernel."""
    H = pt["weight_hh_l0"].shape[1]
    O = pt["fc_weight"].shape[0]
    O_pad = max(128, ((O + 127) // 128) * 128)   # lane-dense FC output

    b0 = _reorder_ifgo_to_ifog(pt["bias_ih_l0"] + pt["bias_hh_l0"])
    b1 = _reorder_ifgo_to_ifog(pt["bias_ih_l1"] + pt["bias_hh_l1"])

    fc_w = jnp.zeros((H, O_pad), jnp.float32).at[:, :O].set(pt["fc_weight"].T)
    fc_b = jnp.zeros((1, O_pad), jnp.float32).at[:, :O].set(pt["fc_bias"])

    return {
        "w_ih0": _reorder_ifgo_to_ifog(pt["weight_ih_l0"]).T,   # (D, 4H)
        "w_hh0": _reorder_ifgo_to_ifog(pt["weight_hh_l0"]).T,   # (H, 4H)
        "b0":    b0.reshape(1, -1),                              # (1, 4H)
        "w_ih1": _reorder_ifgo_to_ifog(pt["weight_ih_l1"]).T,   # (H, 4H)
        "w_hh1": _reorder_ifgo_to_ifog(pt["weight_hh_l1"]).T,   # (H, 4H)
        "b1":    b1.reshape(1, -1),                              # (1, 4H)
        "fc_w":  fc_w,                                           # (H, O_pad)
        "fc_b":  fc_b,                                           # (1, O_pad)
        "O":     O,
        "O_pad": O_pad,
    }


# ------------------------------- wrapper ---------------------------------- #
def observation_conditioned_rnn(inputs, h_0, c_0, pt_params):
    """inputs: (B, T, D) batch_first (PyTorch convention).
    h_0, c_0: (num_layers=2, B, H).  Returns (out (B,T,O), (h_n, c_n))."""
    B, T, D = inputs.shape
    L, _, H = h_0.shape
    assert L == 2, "kernel implements the module's num_layers=2"
    p = pack_params(pt_params)
    O, O_pad = p["O"], p["O_pad"]

    # Pad batch to a full sublane tile so every per-step row block inside the kernel
    # is an (8,128)-aligned tile (unmasked loads/stores on the serial path).
    Bp = max(8, ((B + 7) // 8) * 8)

    # Time-major + batch-pad + flatten (a few hundred bytes, done once in XLA).
    x_t = jnp.transpose(inputs, (1, 0, 2))                       # (T, B, D)
    x_t = jnp.pad(x_t, ((0, 0), (0, Bp - B), (0, 0)))            # (T, Bp, D)
    x2 = x_t.reshape(T * Bp, D)
    h0p = jnp.pad(h_0, ((0, 0), (0, Bp - B), (0, 0)))            # (L, Bp, H)
    c0p = jnp.pad(c_0, ((0, 0), (0, Bp - B), (0, 0)))

    out2, hc = pl.pallas_call(
        _lstm_fused_kernel,
        out_shape=[
            jax.ShapeDtypeStruct((T * Bp, O_pad), jnp.float32),  # lane-dense output
            jax.ShapeDtypeStruct((Bp, 4 * H), jnp.float32),      # packed [h0|h1|c0|c1]
        ],
        scratch_shapes=[
            pltpu.VMEM((T * Bp, 4 * H), jnp.float32),   # hoisted layer-0 input gates
            pltpu.VMEM((T * Bp, H), jnp.float32),       # layer-1 hidden history
        ],
        compiler_params=pltpu.CompilerParams(vmem_limit_bytes=16 * 1024 * 1024),
    )(x2, h0p, c0p,
      p["w_ih0"], p["w_hh0"], p["b0"],
      p["w_ih1"], p["w_hh1"], p["b1"],
      p["fc_w"], p["fc_b"])

    out = out2.reshape(T, Bp, O_pad)[:, :B, :O].transpose(1, 0, 2)    # (B, T, O)
    h_n = jnp.stack([hc[:B, 0 * H:1 * H], hc[:B, 1 * H:2 * H]], axis=0)
    c_n = jnp.stack([hc[:B, 2 * H:3 * H], hc[:B, 3 * H:4 * H]], axis=0)
    return out, (h_n, c_n)


# --------------------------- pure-JAX reference ---------------------------- #
def reference(inputs, h_0, c_0, pt):
    T = inputs.shape[1]

    def cell(x, h, c, w_ih, w_hh, b_ih, b_hh):
        g = x @ w_ih.T + b_ih + h @ w_hh.T + b_hh
        i, f, gg, o = jnp.split(g, 4, axis=-1)
        c = jax.nn.sigmoid(f) * c + jax.nn.sigmoid(i) * jnp.tanh(gg)
        h = jax.nn.sigmoid(o) * jnp.tanh(c)
        return h, c

    h0, c0 = h_0[0], c_0[0]
    h1, c1 = h_0[1], c_0[1]
    outs = []
    for t in range(T):
        x = inputs[:, t]
        h0, c0 = cell(x, h0, c0, pt["weight_ih_l0"], pt["weight_hh_l0"],
                      pt["bias_ih_l0"], pt["bias_hh_l0"])
        h1, c1 = cell(h0, h1, c1, pt["weight_ih_l1"], pt["weight_hh_l1"],
                      pt["bias_ih_l1"], pt["bias_hh_l1"])
        outs.append(jnp.tanh(h1 @ pt["fc_weight"].T + pt["fc_bias"]) * 80.0)
    out = jnp.stack(outs, axis=1)
    return out, (jnp.stack([h0, h1]), jnp.stack([c0, c1]))


# --------------------------------- main ------------------------------------ #
if __name__ == "__main__":
    B, T = 2, 8          # batch, sequence length
    D, H, O, L = 4, 32, 6, 2

    key = jax.random.PRNGKey(0)
    ks = jax.random.split(key, 16)
    k = 1.0 / jnp.sqrt(H)

    def u(key, shape):
        return jax.random.uniform(key, shape, jnp.float32, minval=-k, maxval=k)

    # PyTorch-layout parameters: LSTM W_ih (4H,in), W_hh (4H,H), separate biases,
    # fc weight (O,H), fc bias (O,).  Gate order i, f, g, o.
    pt_params = {
        "weight_ih_l0": u(ks[0], (4 * H, D)),
        "weight_hh_l0": u(ks[1], (4 * H, H)),
        "bias_ih_l0":   u(ks[2], (4 * H,)),
        "bias_hh_l0":   u(ks[3], (4 * H,)),
        "weight_ih_l1": u(ks[4], (4 * H, H)),
        "weight_hh_l1": u(ks[5], (4 * H, H)),
        "bias_ih_l1":   u(ks[6], (4 * H,)),
        "bias_hh_l1":   u(ks[7], (4 * H,)),
        "fc_weight":    u(ks[8], (O, H)),
        "fc_bias":      u(ks[9], (O,)),
    }

    inputs = jax.random.normal(ks[10], (B, T, D), jnp.float32)
    h_0 = jax.random.normal(ks[11], (L, B, H), jnp.float32)
    c_0 = jax.random.normal(ks[12], (L, B, H), jnp.float32)

    out, (h_n, c_n) = observation_conditioned_rnn(inputs, h_0, c_0, pt_params)
    jax.block_until_ready((out, h_n, c_n))

    out_ref, (hn_ref, cn_ref) = reference(inputs, h_0, c_0, pt_params)
    assert out.shape == (B, T, O)
    assert h_n.shape == (L, B, H) and c_n.shape == (L, B, H)
    assert jnp.allclose(out, out_ref, atol=1e-4, rtol=1e-4)
    assert jnp.allclose(h_n, hn_ref, atol=1e-4, rtol=1e-4)
    assert jnp.allclose(c_n, cn_ref, atol=1e-4, rtol=1e-4)

    print("KERNEL_OK")
</pallas_src>

<mosaic_0001>
module attributes {stable_mosaic.version = 11 : i64} {
  func.func @_lstm_fused_kernel(%arg0: memref<64x4xf32, #tpu.memory_space<vmem>>, %arg1: memref<2x8x32xf32, #tpu.memory_space<vmem>>, %arg2: memref<2x8x32xf32, #tpu.memory_space<vmem>>, %arg3: memref<4x128xf32, #tpu.memory_space<vmem>>, %arg4: memref<32x128xf32, #tpu.memory_space<vmem>>, %arg5: memref<1x128xf32, #tpu.memory_space<vmem>>, %arg6: memref<32x128xf32, #tpu.memory_space<vmem>>, %arg7: memref<32x128xf32, #tpu.memory_space<vmem>>, %arg8: memref<1x128xf32, #tpu.memory_space<vmem>>, %arg9: memref<32x128xf32, #tpu.memory_space<vmem>>, %arg10: memref<1x128xf32, #tpu.memory_space<vmem>>, %arg11: memref<64x128xf32, #tpu.memory_space<vmem>>, %arg12: memref<8x128xf32, #tpu.memory_space<vmem>>, %arg13: memref<64x128xf32, #tpu.memory_space<vmem>>, %arg14: memref<64x32xf32, #tpu.memory_space<vmem>>) attributes {dimension_semantics = [], scalar_prefetch = 0 : i64, scratch_operands = 2 : i64, tpu.core_type = #tpu.core_type<tc>} {
    %c0 = arith.constant 0 : index
    %c0_0 = arith.constant 0 : index
    %0 = vector.load %arg0[%c0, %c0_0] : memref<64x4xf32, #tpu.memory_space<vmem>>, vector<64x4xf32>
    %c0_1 = arith.constant 0 : index
    %c0_2 = arith.constant 0 : index
    %1 = vector.load %arg3[%c0_1, %c0_2] : memref<4x128xf32, #tpu.memory_space<vmem>>, vector<4x128xf32>
    %cst = arith.constant dense<0.000000e+00> : vector<64x128xf32>
    %2 = tpu.matmul %0, %1, %cst {dimension_numbers = #tpu.dot_dimension_numbers<[1], [0], [0], [1], [0, 0, 1, 1], [], []>} : vector<64x4xf32>, vector<4x128xf32>, vector<64x128xf32> -> vector<64x128xf32>
    %c0_3 = arith.constant 0 : index
    %c0_4 = arith.constant 0 : index
    %3 = vector.load %arg5[%c0_3, %c0_4] : memref<1x128xf32, #tpu.memory_space<vmem>>, vector<1x128xf32>
    %4 = vector.broadcast %3 : vector<1x128xf32> to vector<64x128xf32>
    %5 = arith.addf %2, %4 : vector<64x128xf32>
    %c0_5 = arith.constant 0 : index
    %c0_6 = arith.constant 0 : index
    %6 = vector.load %arg13[%c0_5, %c0_6] : memref<64x128xf32, #tpu.memory_space<vmem>>, vector<64x128xf32>
    tpu.vector_store %arg13[%c0_5, %c0_6], %5 {strides = array<i32>} : memref<64x128xf32, #tpu.memory_space<vmem>>, vector<64x128xf32>,
    %c0_7 = arith.constant 0 : index
    %c0_8 = arith.constant 0 : index
    %7 = vector.load %arg4[%c0_7, %c0_8] : memref<32x128xf32, #tpu.memory_space<vmem>>, vector<32x128xf32>
    %c0_9 = arith.constant 0 : index
    %c0_10 = arith.constant 0 : index
    %8 = vector.load %arg6[%c0_9, %c0_10] : memref<32x128xf32, #tpu.memory_space<vmem>>, vector<32x128xf32>
    %c0_11 = arith.constant 0 : index
    %c0_12 = arith.constant 0 : index
    %9 = vector.load %arg7[%c0_11, %c0_12] : memref<32x128xf32, #tpu.memory_space<vmem>>, vector<32x128xf32>
    %c0_13 = arith.constant 0 : index
    %c0_14 = arith.constant 0 : index
    %10 = vector.load %arg8[%c0_13, %c0_14] : memref<1x128xf32, #tpu.memory_space<vmem>>, vector<1x128xf32>
    %11 = vector.shape_cast %10 : vector<1x128xf32> to vector<1x128xf32>
    %12 = vector.broadcast %11 : vector<1x128xf32> to vector<8x128xf32>
    %c1 = arith.constant 1 : index
    %c0_15 = arith.constant 0 : index
    %c0_16 = arith.constant 0 : index
    %13 = vector.load %arg1[%c1, %c0_15, %c0_16] : memref<2x8x32xf32, #tpu.memory_space<vmem>>, vector<1x8x32xf32>
    %14 = vector.shape_cast %13 : vector<1x8x32xf32> to vector<8x32xf32>
    %c1_17 = arith.constant 1 : index
    %c0_18 = arith.constant 0 : index
    %c0_19 = arith.constant 0 : index
    %15 = vector.load %arg2[%c1_17, %c0_18, %c0_19] : memref<2x8x32xf32, #tpu.memory_space<vmem>>, vector<1x8x32xf32>
    %16 = vector.shape_cast %15 : vector<1x8x32xf32> to vector<8x32xf32>
    %c0_20 = arith.constant 0 : index
    %c0_21 = arith.constant 0 : index
    %c0_22 = arith.constant 0 : index
    %17 = vector.load %arg1[%c0_20, %c0_21, %c0_22] : memref<2x8x32xf32, #tpu.memory_space<vmem>>, vector<1x8x32xf32>
    %18 = vector.shape_cast %17 : vector<1x8x32xf32> to vector<8x32xf32>
    %c0_23 = arith.constant 0 : index
    %c0_24 = arith.constant 0 : index
    %c0_25 = arith.constant 0 : index
    %19 = vector.load %arg2[%c0_23, %c0_24, %c0_25] : memref<2x8x32xf32, #tpu.memory_space<vmem>>, vector<1x8x32xf32>
    %20 = vector.shape_cast %19 : vector<1x8x32xf32> to vector<8x32xf32>
    %c0_i32 = arith.constant 0 : i32
    %21 = tpu.assume_multiple %c0_i32, 8 : i32
    %22 = arith.index_cast %21 : i32 to index
    %c0_26 = arith.constant 0 : index
    %23 = vector.load %arg13[%22, %c0_26] : memref<64x128xf32, #tpu.memory_space<vmem>>, vector<8x128xf32>
    %cst_27 = arith.constant dense<0.000000e+00> : vector<8x128xf32>
    %24 = tpu.matmul %18, %7, %cst_27 {dimension_numbers = #tpu.dot_dimension_numbers<[1], [0], [0], [1], [0, 0, 1, 1], [], []>} : vector<8x32xf32>, vector<32x128xf32>, vector<8x128xf32> -> vector<8x128xf32>
    %25 = arith.addf %23, %24 : vector<8x128xf32>
    %26 = arith.negf %25 : vector<8x128xf32>
    %27 = math.exp %26 : vector<8x128xf32>
    %cst_28 = arith.constant 1.000000e+00 : f32
    %28 = vector.broadcast %cst_28 : f32 to vector<8x128xf32>
    %29 = arith.addf %28, %27 : vector<8x128xf32>
    %30 = arith.divf %28, %29 : vector<8x128xf32>
    %31 = math.tanh %25 : vector<8x128xf32>
    %32 = vector.extract_strided_slice %30 {offsets = [0, 0], sizes = [8, 32], strides = [1, 1]} : vector<8x128xf32> to vector<8x32xf32>
    %33 = vector.extract_strided_slice %30 {offsets = [0, 32], sizes = [8, 32], strides = [1, 1]} : vector<8x128xf32> to vector<8x32xf32>
    %34 = vector.extract_strided_slice %30 {offsets = [0, 64], sizes = [8, 32], strides = [1, 1]} : vector<8x128xf32> to vector<8x32xf32>
    %35 = vector.extract_strided_slice %31 {offsets = [0, 96], sizes = [8, 32], strides = [1, 1]} : vector<8x128xf32> to vector<8x32xf32>
    %36 = arith.mulf %33, %20 : vector<8x32xf32>
    %37 = arith.mulf %32, %35 : vector<8x32xf32>
    %38 = arith.addf %36, %37 : vector<8x32xf32>
    %39 = math.tanh %38 : vector<8x32xf32>
    %40 = arith.mulf %34, %39 : vector<8x32xf32>
    %c1_i32 = arith.constant 1 : i32
    %c8_i32 = arith.constant 8 : i32
    %41 = arith.muli %c1_i32, %c8_i32 : i32
    %42 = tpu.assume_multiple %41, 8 : i32
    %43 = arith.index_cast %42 : i32 to index
    %c0_29 = arith.constant 0 : index
    %44 = vector.load %arg13[%43, %c0_29] : memref<64x128xf32, #tpu.memory_space<vmem>>, vector<8x128xf32>
    %cst_30 = arith.constant dense<0.000000e+00> : vector<8x128xf32>
    %45 = tpu.matmul %40, %7, %cst_30 {dimension_numbers = #tpu.dot_dimension_numbers<[1], [0], [0], [1], [0, 0, 1, 1], [], []>} : vector<8x32xf32>, vector<32x128xf32>, vector<8x128xf32> -> vector<8x128xf32>
    %46 = arith.addf %44, %45 : vector<8x128xf32>
    %47 = arith.negf %46 : vector<8x128xf32>
    %48 = math.exp %47 : vector<8x128xf32>
    %cst_31 = arith.constant 1.000000e+00 : f32
    %49 = vector.broadcast %cst_31 : f32 to vector<8x128xf32>
    %50 = arith.addf %49, %48 : vector<8x128xf32>
    %51 = arith.divf %49, %50 : vector<8x128xf32>
    %52 = math.tanh %46 : vector<8x128xf32>
    %53 = vector.extract_strided_slice %51 {offsets = [0, 0], sizes = [8, 32], strides = [1, 1]} : vector<8x128xf32> to vector<8x32xf32>
    %54 = vector.extract_strided_slice %51 {offsets = [0, 32], sizes = [8, 32], strides = [1, 1]} : vector<8x128xf32> to vector<8x32xf32>
    %55 = vector.extract_strided_slice %51 {offsets = [0, 64], sizes = [8, 32], strides = [1, 1]} : vector<8x128xf32> to vector<8x32xf32>
    %56 = vector.extract_strided_slice %52 {offsets = [0, 96], sizes = [8, 32], strides = [1, 1]} : vector<8x128xf32> to vector<8x32xf32>
    %57 = arith.mulf %54, %38 : vector<8x32xf32>
    %58 = arith.mulf %53, %56 : vector<8x32xf32>
    %59 = arith.addf %57, %58 : vector<8x32xf32>
    %60 = math.tanh %59 : vector<8x32xf32>
    %61 = arith.mulf %55, %60 : vector<8x32xf32>
    %cst_32 = arith.constant dense<0.000000e+00> : vector<8x128xf32>
    %62 = tpu.matmul %40, %8, %cst_32 {dimension_numbers = #tpu.dot_dimension_numbers<[1], [0], [0], [1], [0, 0, 1, 1], [], []>} : vector<8x32xf32>, vector<32x128xf32>, vector<8x128xf32> -> vector<8x128xf32>
    %cst_33 = arith.constant dense<0.000000e+00> : vector<8x128xf32>
    %63 = tpu.matmul %14, %9, %cst_33 {dimension_numbers = #tpu.dot_dimension_numbers<[1], [0], [0], [1], [0, 0, 1, 1], [], []>} : vector<8x32xf32>, vector<32x128xf32>, vector<8x128xf32> -> vector<8x128xf32>
    %64 = arith.addf %62, %63 : vector<8x128xf32>
    %65 = arith.addf %64, %12 : vector<8x128xf32>
    %66 = arith.negf %65 : vector<8x128xf32>
    %67 = math.exp %66 : vector<8x128xf32>
    %cst_34 = arith.constant 1.000000e+00 : f32
    %68 = vector.broadcast %cst_34 : f32 to vector<8x128xf32>
    %69 = arith.addf %68, %67 : vector<8x128xf32>
    %70 = arith.divf %68, %69 : vector<8x128xf32>
    %71 = math.tanh %65 : vector<8x128xf32>
    %72 = vector.extract_strided_slice %70 {offsets = [0, 0], sizes = [8, 32], strides = [1, 1]} : vector<8x128xf32> to vector<8x32xf32>
    %73 = vector.extract_strided_slice %70 {offsets = [0, 32], sizes = [8, 32], strides = [1, 1]} : vector<8x128xf32> to vector<8x32xf32>
    %74 = vector.extract_strided_slice %70 {offsets = [0, 64], sizes = [8, 32], strides = [1, 1]} : vector<8x128xf32> to vector<8x32xf32>
    %75 = vector.extract_strided_slice %71 {offsets = [0, 96], sizes = [8, 32], strides = [1, 1]} : vector<8x128xf32> to vector<8x32xf32>
    %76 = arith.mulf %73, %16 : vector<8x32xf32>
    %77 = arith.mulf %72, %75 : vector<8x32xf32>
    %78 = arith.addf %76, %77 : vector<8x32xf32>
    %79 = math.tanh %78 : vector<8x32xf32>
    %80 = arith.mulf %74, %79 : vector<8x32xf32>
    %c1_i32_35 = arith.constant 1 : i32
    %81 = arith.subi %c1_i32, %c1_i32_35 : i32
    %c8_i32_36 = arith.constant 8 : i32
    %82 = arith.muli %81, %c8_i32_36 : i32
    %83 = tpu.assume_multiple %82, 8 : i32
    %84 = arith.index_cast %83 : i32 to index
    %c0_37 = arith.constant 0 : index
    %85 = vector.load %arg14[%84, %c0_37] : memref<64x32xf32, #tpu.memory_space<vmem>>, vector<8x32xf32>
    tpu.vector_store %arg14[%84, %c0_37], %80 {strides = array<i32>} : memref<64x32xf32, #tpu.memory_space<vmem>>, vector<8x32xf32>,
    %c2_i32 = arith.constant 2 : i32
    %c8_i32_38 = arith.constant 8 : i32
    %86 = arith.muli %c2_i32, %c8_i32_38 : i32
    %87 = tpu.assume_multiple %86, 8 : i32
    %88 = arith.index_cast %87 : i32 to index
    %c0_39 = arith.constant 0 : index
    %89 = vector.load %arg13[%88, %c0_39] : memref<64x128xf32, #tpu.memory_space<vmem>>, vector<8x128xf32>
    %cst_40 = arith.constant dense<0.000000e+00> : vector<8x128xf32>
    %90 = tpu.matmul %61, %7, %cst_40 {dimension_numbers = #tpu.dot_dimension_numbers<[1], [0], [0], [1], [0, 0, 1, 1], [], []>} : vector<8x32xf32>, vector<32x128xf32>, vector<8x128xf32> -> vector<8x128xf32>
    %91 = arith.addf %89, %90 : vector<8x128xf32>
    %92 = arith.negf %91 : vector<8x128xf32>
    %93 = math.exp %92 : vector<8x128xf32>
    %cst_41 = arith.constant 1.000000e+00 : f32
    %94 = vector.broadcast %cst_41 : f32 to vector<8x128xf32>
    %95 = arith.addf %94, %93 : vector<8x128xf32>
    %96 = arith.divf %94, %95 : vector<8x128xf32>
    %97 = math.tanh %91 : vector<8x128xf32>
    %98 = vector.extract_strided_slice %96 {offsets = [0, 0], sizes = [8, 32], strides = [1, 1]} : vector<8x128xf32> to vector<8x32xf32>
    %99 = vector.extract_strided_slice %96 {offsets = [0, 32], sizes = [8, 32], strides = [1, 1]} : vector<8x128xf32> to vector<8x32xf32>
    %100 = vector.extract_strided_slice %96 {offsets = [0, 64], sizes = [8, 32], strides = [1, 1]} : vector<8x128xf32> to vector<8x32xf32>
    %101 = vector.extract_strided_slice %97 {offsets = [0, 96], sizes = [8, 32], strides = [1, 1]} : vector<8x128xf32> to vector<8x32xf32>
    %102 = arith.mulf %99, %59 : vector<8x32xf32>
    %103 = arith.mulf %98, %101 : vector<8x32xf32>
    %104 = arith.addf %102, %103 : vector<8x32xf32>
    %105 = math.tanh %104 : vector<8x32xf32>
    %106 = arith.mulf %100, %105 : vector<8x32xf32>
    %cst_42 = arith.constant dense<0.000000e+00> : vector<8x128xf32>
    %107 = tpu.matmul %61, %8, %cst_42 {dimension_numbers = #tpu.dot_dimension_numbers<[1], [0], [0], [1], [0, 0, 1, 1], [], []>} : vector<8x32xf32>, vector<32x128xf32>, vector<8x128xf32> -> vector<8x128xf32>
    %cst_43 = arith.constant dense<0.000000e+00> : vector<8x128xf32>
    %108 = tpu.matmul %80, %9, %cst_43 {dimension_numbers = #tpu.dot_dimension_numbers<[1], [0], [0], [1], [0, 0, 1, 1], [], []>} : vector<8x32xf32>, vector<32x128xf32>, vector<8x128xf32> -> vector<8x128xf32>
    %109 = arith.addf %107, %108 : vector<8x128xf32>
    %110 = arith.addf %109, %12 : vector<8x128xf32>
    %111 = arith.negf %110 : vector<8x128xf32>
    %112 = math.exp %111 : vector<8x128xf32>
    %cst_44 = arith.constant 1.000000e+00 : f32
    %113 = vector.broadcast %cst_44 : f32 to vector<8x128xf32>
    %114 = arith.addf %113, %112 : vector<8x128xf32>
    %115 = arith.divf %113, %114 : vector<8x128xf32>
    %116 = math.tanh %110 : vector<8x128xf32>
    %117 = vector.extract_strided_slice %115 {offsets = [0, 0], sizes = [8, 32], strides = [1, 1]} : vector<8x128xf32> to vector<8x32xf32>
    %118 = vector.extract_strided_slice %115 {offsets = [0, 32], sizes = [8, 32], strides = [1, 1]} : vector<8x128xf32> to vector<8x32xf32>
    %119 = vector.extract_strided_slice %115 {offsets = [0, 64], sizes = [8, 32], strides = [1, 1]} : vector<8x128xf32> to vector<8x32xf32>
    %120 = vector.extract_strided_slice %116 {offsets = [0, 96], sizes = [8, 32], strides = [1, 1]} : vector<8x128xf32> to vector<8x32xf32>
    %121 = arith.mulf %118, %78 : vector<8x32xf32>
    %122 = arith.mulf %117, %120 : vector<8x32xf32>
    %123 = arith.addf %121, %122 : vector<8x32xf32>
    %124 = math.tanh %123 : vector<8x32xf32>
    %125 = arith.mulf %119, %124 : vector<8x32xf32>
    %c1_i32_45 = arith.constant 1 : i32
    %126 = arith.subi %c2_i32, %c1_i32_45 : i32
    %c8_i32_46 = arith.constant 8 : i32
    %127 = arith.muli %126, %c8_i32_46 : i32
    %128 = tpu.assume_multiple %127, 8 : i32
    %129 = arith.index_cast %128 : i32 to index
    %c0_47 = arith.constant 0 : index
    %130 = vector.load %arg14[%129, %c0_47] : memref<64x32xf32, #tpu.memory_space<vmem>>, vector<8x32xf32>
    tpu.vector_store %arg14[%129, %c0_47], %125 {strides = array<i32>} : memref<64x32xf32, #tpu.memory_space<vmem>>, vector<8x32xf32>,
    %c3_i32 = arith.constant 3 : i32
    %c8_i32_48 = arith.constant 8 : i32
    %131 = arith.muli %c3_i32, %c8_i32_48 : i32
    %132 = tpu.assume_multiple %131, 8 : i32
    %133 = arith.index_cast %132 : i32 to index
    %c0_49 = arith.constant 0 : index
    %134 = vector.load %arg13[%133, %c0_49] : memref<64x128xf32, #tpu.memory_space<vmem>>, vector<8x128xf32>
    %cst_50 = arith.constant dense<0.000000e+00> : vector<8x128xf32>
    %135 = tpu.matmul %106, %7, %cst_50 {dimension_numbers = #tpu.dot_dimension_numbers<[1], [0], [0], [1], [0, 0, 1, 1], [], []>} : vector<8x32xf32>, vector<32x128xf32>, vector<8x128xf32> -> vector<8x128xf32>
    %136 = arith.addf %134, %135 : vector<8x128xf32>
    %137 = arith.negf %136 : vector<8x128xf32>
    %138 = math.exp %137 : vector<8x128xf32>
    %cst_51 = arith.constant 1.000000e+00 : f32
    %139 = vector.broadcast %cst_51 : f32 to vector<8x128xf32>
    %140 = arith.addf %139, %138 : vector<8x128xf32>
    %141 = arith.divf %139, %140 : vector<8x128xf32>
    %142 = math.tanh %136 : vector<8x128xf32>
    %143 = vector.extract_strided_slice %141 {offsets = [0, 0], sizes = [8, 32], strides = [1, 1]} : vector<8x128xf32> to vector<8x32xf32>
    %144 = vector.extract_strided_slice %141 {offsets = [0, 32], sizes = [8, 32], strides = [1, 1]} : vector<8x128xf32> to vector<8x32xf32>
    %145 = vector.extract_strided_slice %141 {offsets = [0, 64], sizes = [8, 32], strides = [1, 1]} : vector<8x128xf32> to vector<8x32xf32>
    %146 = vector.extract_strided_slice %142 {offsets = [0, 96], sizes = [8, 32], strides = [1, 1]} : vector<8x128xf32> to vector<8x32xf32>
    %147 = arith.mulf %144, %104 : vector<8x32xf32>
    %148 = arith.mulf %143, %146 : vector<8x32xf32>
    %149 = arith.addf %147, %148 : vector<8x32xf32>
    %150 = math.tanh %149 : vector<8x32xf32>
    %151 = arith.mulf %145, %150 : vector<8x32xf32>
    %cst_52 = arith.constant dense<0.000000e+00> : vector<8x128xf32>
    %152 = tpu.matmul %106, %8, %cst_52 {dimension_numbers = #tpu.dot_dimension_numbers<[1], [0], [0], [1], [0, 0, 1, 1], [], []>} : vector<8x32xf32>, vector<32x128xf32>, vector<8x128xf32> -> vector<8x128xf32>
    %cst_53 = arith.constant dense<0.000000e+00> : vector<8x128xf32>
    %153 = tpu.matmul %125, %9, %cst_53 {dimension_numbers = #tpu.dot_dimension_numbers<[1], [0], [0], [1], [0, 0, 1, 1], [], []>} : vector<8x32xf32>, vector<32x128xf32>, vector<8x128xf32> -> vector<8x128xf32>
    %154 = arith.addf %152, %153 : vector<8x128xf32>
    %155 = arith.addf %154, %12 : vector<8x128xf32>
    %156 = arith.negf %155 : vector<8x128xf32>
    %157 = math.exp %156 : vector<8x128xf32>
    %cst_54 = arith.constant 1.000000e+00 : f32
    %158 = vector.broadcast %cst_54 : f32 to vector<8x128xf32>
    %159 = arith.addf %158, %157 : vector<8x128xf32>
    %160 = arith.divf %158, %159 : vector<8x128xf32>
    %161 = math.tanh %155 : vector<8x128xf32>
    %162 = vector.extract_strided_slice %160 {offsets = [0, 0], sizes = [8, 32], strides = [1, 1]} : vector<8x128xf32> to vector<8x32xf32>
    %163 = vector.extract_strided_slice %160 {offsets = [0, 32], sizes = [8, 32], strides = [1, 1]} : vector<8x128xf32> to vector<8x32xf32>
    %164 = vector.extract_strided_slice %160 {offsets = [0, 64], sizes = [8, 32], strides = [1, 1]} : vector<8x128xf32> to vector<8x32xf32>
    %165 = vector.extract_strided_slice %161 {offsets = [0, 96], sizes = [8, 32], strides = [1, 1]} : vector<8x128xf32> to vector<8x32xf32>
    %166 = arith.mulf %163, %123 : vector<8x32xf32>
    %167 = arith.mulf %162, %165 : vector<8x32xf32>
    %168 = arith.addf %166, %167 : vector<8x32xf32>
    %169 = math.tanh %168 : vector<8x32xf32>
    %170 = arith.mulf %164, %169 : vector<8x32xf32>
    %c1_i32_55 = arith.constant 1 : i32
    %171 = arith.subi %c3_i32, %c1_i32_55 : i32
    %c8_i32_56 = arith.constant 8 : i32
    %172 = arith.muli %171, %c8_i32_56 : i32
    %173 = tpu.assume_multiple %172, 8 : i32
    %174 = arith.index_cast %173 : i32 to index
    %c0_57 = arith.constant 0 : index
    %175 = vector.load %arg14[%174, %c0_57] : memref<64x32xf32, #tpu.memory_space<vmem>>, vector<8x32xf32>
    tpu.vector_store %arg14[%174, %c0_57], %170 {strides = array<i32>} : memref<64x32xf32, #tpu.memory_space<vmem>>, vector<8x32xf32>,
    %c4_i32 = arith.constant 4 : i32
    %c8_i32_58 = arith.constant 8 : i32
    %176 = arith.muli %c4_i32, %c8_i32_58 : i32
    %177 = tpu.assume_multiple %176, 8 : i32
    %178 = arith.index_cast %177 : i32 to index
    %c0_59 = arith.constant 0 : index
    %179 = vector.load %arg13[%178, %c0_59] : memref<64x128xf32, #tpu.memory_space<vmem>>, vector<8x128xf32>
    %cst_60 = arith.constant dense<0.000000e+00> : vector<8x128xf32>
    %180 = tpu.matmul %151, %7, %cst_60 {dimension_numbers = #tpu.dot_dimension_numbers<[1], [0], [0], [1], [0, 0, 1, 1], [], []>} : vector<8x32xf32>, vector<32x128xf32>, vector<8x128xf32> -> vector<8x128xf32>
    %181 = arith.addf %179, %180 : vector<8x128xf32>
    %182 = arith.negf %181 : vector<8x128xf32>
    %183 = math.exp %182 : vector<8x128xf32>
    %cst_61 = arith.constant 1.000000e+00 : f32
    %184 = vector.broadcast %cst_61 : f32 to vector<8x128xf32>
    %185 = arith.addf %184, %183 : vector<8x128xf32>
    %186 = arith.divf %184, %185 : vector<8x128xf32>
    %187 = math.tanh %181 : vector<8x128xf32>
    %188 = vector.extract_strided_slice %186 {offsets = [0, 0], sizes = [8, 32], strides = [1, 1]} : vector<8x128xf32> to vector<8x32xf32>
    %189 = vector.extract_strided_slice %186 {offsets = [0, 32], sizes = [8, 32], strides = [1, 1]} : vector<8x128xf32> to vector<8x32xf32>
    %190 = vector.extract_strided_slice %186 {offsets = [0, 64], sizes = [8, 32], strides = [1, 1]} : vector<8x128xf32> to vector<8x32xf32>
    %191 = vector.extract_strided_slice %187 {offsets = [0, 96], sizes = [8, 32], strides = [1, 1]} : vector<8x128xf32> to vector<8x32xf32>
    %192 = arith.mulf %189, %149 : vector<8x32xf32>
    %193 = arith.mulf %188, %191 : vector<8x32xf32>
    %194 = arith.addf %192, %193 : vector<8x32xf32>
    %195 = math.tanh %194 : vector<8x32xf32>
    %196 = arith.mulf %190, %195 : vector<8x32xf32>
    %cst_62 = arith.constant dense<0.000000e+00> : vector<8x128xf32>
    %197 = tpu.matmul %151, %8, %cst_62 {dimension_numbers = #tpu.dot_dimension_numbers<[1], [0], [0], [1], [0, 0, 1, 1], [], []>} : vector<8x32xf32>, vector<32x128xf32>, vector<8x128xf32> -> vector<8x128xf32>
    %cst_63 = arith.constant dense<0.000000e+00> : vector<8x128xf32>
    %198 = tpu.matmul %170, %9, %cst_63 {dimension_numbers = #tpu.dot_dimension_numbers<[1], [0], [0], [1], [0, 0, 1, 1], [], []>} : vector<8x32xf32>, vector<32x128xf32>, vector<8x128xf32> -> vector<8x128xf32>
    %199 = arith.addf %197, %198 : vector<8x128xf32>
    %200 = arith.addf %199, %12 : vector<8x128xf32>
    %201 = arith.negf %200 : vector<8x128xf32>
    %202 = math.exp %201 : vector<8x128xf32>
    %cst_64 = arith.constant 1.000000e+00 : f32
    %203 = vector.broadcast %cst_64 : f32 to vector<8x128xf32>
    %204 = arith.addf %203, %202 : vector<8x128xf32>
    %205 = arith.divf %203, %204 : vector<8x128xf32>
    %206 = math.tanh %200 : vector<8x128xf32>
    %207 = vector.extract_strided_slice %205 {offsets = [0, 0], sizes = [8, 32], strides = [1, 1]} : vector<8x128xf32> to vector<8x32xf32>
    %208 = vector.extract_strided_slice %205 {offsets = [0, 32], sizes = [8, 32], strides = [1, 1]} : vector<8x128xf32> to vector<8x32xf32>
    %209 = vector.extract_strided_slice %205 {offsets = [0, 64], sizes = [8, 32], strides = [1, 1]} : vector<8x128xf32> to vector<8x32xf32>
    %210 = vector.extract_strided_slice %206 {offsets = [0, 96], sizes = [8, 32], strides = [1, 1]} : vector<8x128xf32> to vector<8x32xf32>
    %211 = arith.mulf %208, %168 : vector<8x32xf32>
    %212 = arith.mulf %207, %210 : vector<8x32xf32>
    %213 = arith.addf %211, %212 : vector<8x32xf32>
    %214 = math.tanh %213 : vector<8x32xf32>
    %215 = arith.mulf %209, %214 : vector<8x32xf32>
    %c1_i32_65 = arith.constant 1 : i32
    %216 = arith.subi %c4_i32, %c1_i32_65 : i32
    %c8_i32_66 = arith.constant 8 : i32
    %217 = arith.muli %216, %c8_i32_66 : i32
    %218 = tpu.assume_multiple %217, 8 : i32
    %219 = arith.index_cast %218 : i32 to index
    %c0_67 = arith.constant 0 : index
    %220 = vector.load %arg14[%219, %c0_67] : memref<64x32xf32, #tpu.memory_space<vmem>>, vector<8x32xf32>
    tpu.vector_store %arg14[%219, %c0_67], %215 {strides = array<i32>} : memref<64x32xf32, #tpu.memory_space<vmem>>, vector<8x32xf32>,
    %c5_i32 = arith.constant 5 : i32
    %c8_i32_68 = arith.constant 8 : i32
    %221 = arith.muli %c5_i32, %c8_i32_68 : i32
    %222 = tpu.assume_multiple %221, 8 : i32
    %223 = arith.index_cast %222 : i32 to index
    %c0_69 = arith.constant 0 : index
    %224 = vector.load %arg13[%223, %c0_69] : memref<64x128xf32, #tpu.memory_space<vmem>>, vector<8x128xf32>
    %cst_70 = arith.constant dense<0.000000e+00> : vector<8x128xf32>
    %225 = tpu.matmul %196, %7, %cst_70 {dimension_numbers = #tpu.dot_dimension_numbers<[1], [0], [0], [1], [0, 0, 1, 1], [], []>} : vector<8x32xf32>, vector<32x128xf32>, vector<8x128xf32> -> vector<8x128xf32>
    %226 = arith.addf %224, %225 : vector<8x128xf32>
    %227 = arith.negf %226 : vector<8x128xf32>
    %228 = math.exp %227 : vector<8x128xf32>
    %cst_71 = arith.constant 1.000000e+00 : f32
    %229 = vector.broadcast %cst_71 : f32 to vector<8x128xf32>
    %230 = arith.addf %229, %228 : vector<8x128xf32>
    %231 = arith.divf %229, %230 : vector<8x128xf32>
    %232 = math.tanh %226 : vector<8x128xf32>
    %233 = vector.extract_strided_slice %231 {offsets = [0, 0], sizes = [8, 32], strides = [1, 1]} : vector<8x128xf32> to vector<8x32xf32>
    %234 = vector.extract_strided_slice %231 {offsets = [0, 32], sizes = [8, 32], strides = [1, 1]} : vector<8x128xf32> to vector<8x32xf32>
    %235 = vector.extract_strided_slice %231 {offsets = [0, 64], sizes = [8, 32], strides = [1, 1]} : vector<8x128xf32> to vector<8x32xf32>
    %236 = vector.extract_strided_slice %232 {offsets = [0, 96], sizes = [8, 32], strides = [1, 1]} : vector<8x128xf32> to vector<8x32xf32>
    %237 = arith.mulf %234, %194 : vector<8x32xf32>
    %238 = arith.mulf %233, %236 : vector<8x32xf32>
    %239 = arith.addf %237, %238 : vector<8x32xf32>
    %240 = math.tanh %239 : vector<8x32xf32>
    %241 = arith.mulf %235, %240 : vector<8x32xf32>
    %cst_72 = arith.constant dense<0.000000e+00> : vector<8x128xf32>
    %242 = tpu.matmul %196, %8, %cst_72 {dimension_numbers = #tpu.dot_dimension_numbers<[1], [0], [0], [1], [0, 0, 1, 1], [], []>} : vector<8x32xf32>, vector<32x128xf32>, vector<8x128xf32> -> vector<8x128xf32>
    %cst_73 = arith.constant dense<0.000000e+00> : vector<8x128xf32>
    %243 = tpu.matmul %215, %9, %cst_73 {dimension_numbers = #tpu.dot_dimension_numbers<[1], [0], [0], [1], [0, 0, 1, 1], [], []>} : vector<8x32xf32>, vector<32x128xf32>, vector<8x128xf32> -> vector<8x128xf32>
    %244 = arith.addf %242, %243 : vector<8x128xf32>
    %245 = arith.addf %244, %12 : vector<8x128xf32>
    %246 = arith.negf %245 : vector<8x128xf32>
    %247 = math.exp %246 : vector<8x128xf32>
    %cst_74 = arith.constant 1.000000e+00 : f32
    %248 = vector.broadcast %cst_74 : f32 to vector<8x128xf32>
    %249 = arith.addf %248, %247 : vector<8x128xf32>
    %250 = arith.divf %248, %249 : vector<8x128xf32>
    %251 = math.tanh %245 : vector<8x128xf32>
    %252 = vector.extract_strided_slice %250 {offsets = [0, 0], sizes = [8, 32], strides = [1, 1]} : vector<8x128xf32> to vector<8x32xf32>
    %253 = vector.extract_strided_slice %250 {offsets = [0, 32], sizes = [8, 32], strides = [1, 1]} : vector<8x128xf32> to vector<8x32xf32>
    %254 = vector.extract_strided_slice %250 {offsets = [0, 64], sizes = [8, 32], strides = [1, 1]} : vector<8x128xf32> to vector<8x32xf32>
    %255 = vector.extract_strided_slice %251 {offsets = [0, 96], sizes = [8, 32], strides = [1, 1]} : vector<8x128xf32> to vector<8x32xf32>
    %256 = arith.mulf %253, %213 : vector<8x32xf32>
    %257 = arith.mulf %252, %255 : vector<8x32xf32>
    %258 = arith.addf %256, %257 : vector<8x32xf32>
    %259 = math.tanh %258 : vector<8x32xf32>
    %260 = arith.mulf %254, %259 : vector<8x32xf32>
    %c1_i32_75 = arith.constant 1 : i32
    %261 = arith.subi %c5_i32, %c1_i32_75 : i32
    %c8_i32_76 = arith.constant 8 : i32
    %262 = arith.muli %261, %c8_i32_76 : i32
    %263 = tpu.assume_multiple %262, 8 : i32
    %264 = arith.index_cast %263 : i32 to index
    %c0_77 = arith.constant 0 : index
    %265 = vector.load %arg14[%264, %c0_77] : memref<64x32xf32, #tpu.memory_space<vmem>>, vector<8x32xf32>
    tpu.vector_store %arg14[%264, %c0_77], %260 {strides = array<i32>} : memref<64x32xf32, #tpu.memory_space<vmem>>, vector<8x32xf32>,
    %c6_i32 = arith.constant 6 : i32
    %c8_i32_78 = arith.constant 8 : i32
    %266 = arith.muli %c6_i32, %c8_i32_78 : i32
    %267 = tpu.assume_multiple %266, 8 : i32
    %268 = arith.index_cast %267 : i32 to index
    %c0_79 = arith.constant 0 : index
    %269 = vector.load %arg13[%268, %c0_79] : memref<64x128xf32, #tpu.memory_space<vmem>>, vector<8x128xf32>
    %cst_80 = arith.constant dense<0.000000e+00> : vector<8x128xf32>
    %270 = tpu.matmul %241, %7, %cst_80 {dimension_numbers = #tpu.dot_dimension_numbers<[1], [0], [0], [1], [0, 0, 1, 1], [], []>} : vector<8x32xf32>, vector<32x128xf32>, vector<8x128xf32> -> vector<8x128xf32>
    %271 = arith.addf %269, %270 : vector<8x128xf32>
    %272 = arith.negf %271 : vector<8x128xf32>
    %273 = math.exp %272 : vector<8x128xf32>
    %cst_81 = arith.constant 1.000000e+00 : f32
    %274 = vector.broadcast %cst_81 : f32 to vector<8x128xf32>
    %275 = arith.addf %274, %273 : vector<8x128xf32>
    %276 = arith.divf %274, %275 : vector<8x128xf32>
    %277 = math.tanh %271 : vector<8x128xf32>
    %278 = vector.extract_strided_slice %276 {offsets = [0, 0], sizes = [8, 32], strides = [1, 1]} : vector<8x128xf32> to vector<8x32xf32>
    %279 = vector.extract_strided_slice %276 {offsets = [0, 32], sizes = [8, 32], strides = [1, 1]} : vector<8x128xf32> to vector<8x32xf32>
    %280 = vector.extract_strided_slice %276 {offsets = [0, 64], sizes = [8, 32], strides = [1, 1]} : vector<8x128xf32> to vector<8x32xf32>
    %281 = vector.extract_strided_slice %277 {offsets = [0, 96], sizes = [8, 32], strides = [1, 1]} : vector<8x128xf32> to vector<8x32xf32>
    %282 = arith.mulf %279, %239 : vector<8x32xf32>
    %283 = arith.mulf %278, %281 : vector<8x32xf32>
    %284 = arith.addf %282, %283 : vector<8x32xf32>
    %285 = math.tanh %284 : vector<8x32xf32>
    %286 = arith.mulf %280, %285 : vector<8x32xf32>
    %cst_82 = arith.constant dense<0.000000e+00> : vector<8x128xf32>
    %287 = tpu.matmul %241, %8, %cst_82 {dimension_numbers = #tpu.dot_dimension_numbers<[1], [0], [0], [1], [0, 0, 1, 1], [], []>} : vector<8x32xf32>, vector<32x128xf32>, vector<8x128xf32> -> vector<8x128xf32>
    %cst_83 = arith.constant dense<0.000000e+00> : vector<8x128xf32>
    %288 = tpu.matmul %260, %9, %cst_83 {dimension_numbers = #tpu.dot_dimension_numbers<[1], [0], [0], [1], [0, 0, 1, 1], [], []>} : vector<8x32xf32>, vector<32x128xf32>, vector<8x128xf32> -> vector<8x128xf32>
    %289 = arith.addf %287, %288 : vector<8x128xf32>
    %290 = arith.addf %289, %12 : vector<8x128xf32>
    %291 = arith.negf %290 : vector<8x128xf32>
    %292 = math.exp %291 : vector<8x128xf32>
    %cst_84 = arith.constant 1.000000e+00 : f32
    %293 = vector.broadcast %cst_84 : f32 to vector<8x128xf32>
    %294 = arith.addf %293, %292 : vector<8x128xf32>
    %295 = arith.divf %293, %294 : vector<8x128xf32>
    %296 = math.tanh %290 : vector<8x128xf32>
    %297 = vector.extract_strided_slice %295 {offsets = [0, 0], sizes = [8, 32], strides = [1, 1]} : vector<8x128xf32> to vector<8x32xf32>
    %298 = vector.extract_strided_slice %295 {offsets = [0, 32], sizes = [8, 32], strides = [1, 1]} : vector<8x128xf32> to vector<8x32xf32>
    %299 = vector.extract_strided_slice %295 {offsets = [0, 64], sizes = [8, 32], strides = [1, 1]} : vector<8x128xf32> to vector<8x32xf32>
    %300 = vector.extract_strided_slice %296 {offsets = [0, 96], sizes = [8, 32], strides = [1, 1]} : vector<8x128xf32> to vector<8x32xf32>
    %301 = arith.mulf %298, %258 : vector<8x32xf32>
    %302 = arith.mulf %297, %300 : vector<8x32xf32>
    %303 = arith.addf %301, %302 : vector<8x32xf32>
    %304 = math.tanh %303 : vector<8x32xf32>
    %305 = arith.mulf %299, %304 : vector<8x32xf32>
    %c1_i32_85 = arith.constant 1 : i32
    %306 = arith.subi %c6_i32, %c1_i32_85 : i32
    %c8_i32_86 = arith.constant 8 : i32
    %307 = arith.muli %306, %c8_i32_86 : i32
    %308 = tpu.assume_multiple %307, 8 : i32
    %309 = arith.index_cast %308 : i32 to index
    %c0_87 = arith.constant 0 : index
    %310 = vector.load %arg14[%309, %c0_87] : memref<64x32xf32, #tpu.memory_space<vmem>>, vector<8x32xf32>
    tpu.vector_store %arg14[%309, %c0_87], %305 {strides = array<i32>} : memref<64x32xf32, #tpu.memory_space<vmem>>, vector<8x32xf32>,
    %c7_i32 = arith.constant 7 : i32
    %c8_i32_88 = arith.constant 8 : i32
    %311 = arith.muli %c7_i32, %c8_i32_88 : i32
    %312 = tpu.assume_multiple %311, 8 : i32
    %313 = arith.index_cast %312 : i32 to index
    %c0_89 = arith.constant 0 : index
    %314 = vector.load %arg13[%313, %c0_89] : memref<64x128xf32, #tpu.memory_space<vmem>>, vector<8x128xf32>
    %cst_90 = arith.constant dense<0.000000e+00> : vector<8x128xf32>
    %315 = tpu.matmul %286, %7, %cst_90 {dimension_numbers = #tpu.dot_dimension_numbers<[1], [0], [0], [1], [0, 0, 1, 1], [], []>} : vector<8x32xf32>, vector<32x128xf32>, vector<8x128xf32> -> vector<8x128xf32>
    %316 = arith.addf %314, %315 : vector<8x128xf32>
    %317 = arith.negf %316 : vector<8x128xf32>
    %318 = math.exp %317 : vector<8x128xf32>
    %cst_91 = arith.constant 1.000000e+00 : f32
    %319 = vector.broadcast %cst_91 : f32 to vector<8x128xf32>
    %320 = arith.addf %319, %318 : vector<8x128xf32>
    %321 = arith.divf %319, %320 : vector<8x128xf32>
    %322 = math.tanh %316 : vector<8x128xf32>
    %323 = vector.extract_strided_slice %321 {offsets = [0, 0], sizes = [8, 32], strides = [1, 1]} : vector<8x128xf32> to vector<8x32xf32>
    %324 = vector.extract_strided_slice %321 {offsets = [0, 32], sizes = [8, 32], strides = [1, 1]} : vector<8x128xf32> to vector<8x32xf32>
    %325 = vector.extract_strided_slice %321 {offsets = [0, 64], sizes = [8, 32], strides = [1, 1]} : vector<8x128xf32> to vector<8x32xf32>
    %326 = vector.extract_strided_slice %322 {offsets = [0, 96], sizes = [8, 32], strides = [1, 1]} : vector<8x128xf32> to vector<8x32xf32>
    %327 = arith.mulf %324, %284 : vector<8x32xf32>
    %328 = arith.mulf %323, %326 : vector<8x32xf32>
    %329 = arith.addf %327, %328 : vector<8x32xf32>
    %330 = math.tanh %329 : vector<8x32xf32>
    %331 = arith.mulf %325, %330 : vector<8x32xf32>
    %cst_92 = arith.constant dense<0.000000e+00> : vector<8x128xf32>
    %332 = tpu.matmul %286, %8, %cst_92 {dimension_numbers = #tpu.dot_dimension_numbers<[1], [0], [0], [1], [0, 0, 1, 1], [], []>} : vector<8x32xf32>, vector<32x128xf32>, vector<8x128xf32> -> vector<8x128xf32>
    %cst_93 = arith.constant dense<0.000000e+00> : vector<8x128xf32>
    %333 = tpu.matmul %305, %9, %cst_93 {dimension_numbers = #tpu.dot_dimension_numbers<[1], [0], [0], [1], [0, 0, 1, 1], [], []>} : vector<8x32xf32>, vector<32x128xf32>, vector<8x128xf32> -> vector<8x128xf32>
    %334 = arith.addf %332, %333 : vector<8x128xf32>
    %335 = arith.addf %334, %12 : vector<8x128xf32>
    %336 = arith.negf %335 : vector<8x128xf32>
    %337 = math.exp %336 : vector<8x128xf32>
    %cst_94 = arith.constant 1.000000e+00 : f32
    %338 = vector.broadcast %cst_94 : f32 to vector<8x128xf32>
    %339 = arith.addf %338, %337 : vector<8x128xf32>
    %340 = arith.divf %338, %339 : vector<8x128xf32>
    %341 = math.tanh %335 : vector<8x128xf32>
    %342 = vector.extract_strided_slice %340 {offsets = [0, 0], sizes = [8, 32], strides = [1, 1]} : vector<8x128xf32> to vector<8x32xf32>
    %343 = vector.extract_strided_slice %340 {offsets = [0, 32], sizes = [8, 32], strides = [1, 1]} : vector<8x128xf32> to vector<8x32xf32>
    %344 = vector.extract_strided_slice %340 {offsets = [0, 64], sizes = [8, 32], strides = [1, 1]} : vector<8x128xf32> to vector<8x32xf32>
    %345 = vector.extract_strided_slice %341 {offsets = [0, 96], sizes = [8, 32], strides = [1, 1]} : vector<8x128xf32> to vector<8x32xf32>
    %346 = arith.mulf %343, %303 : vector<8x32xf32>
    %347 = arith.mulf %342, %345 : vector<8x32xf32>
    %348 = arith.addf %346, %347 : vector<8x32xf32>
    %349 = math.tanh %348 : vector<8x32xf32>
    %350 = arith.mulf %344, %349 : vector<8x32xf32>
    %c1_i32_95 = arith.constant 1 : i32
    %351 = arith.subi %c7_i32, %c1_i32_95 : i32
    %c8_i32_96 = arith.constant 8 : i32
    %352 = arith.muli %351, %c8_i32_96 : i32
    %353 = tpu.assume_multiple %352, 8 : i32
    %354 = arith.index_cast %353 : i32 to index
    %c0_97 = arith.constant 0 : index
    %355 = vector.load %arg14[%354, %c0_97] : memref<64x32xf32, #tpu.memory_space<vmem>>, vector<8x32xf32>
    tpu.vector_store %arg14[%354, %c0_97], %350 {strides = array<i32>} : memref<64x32xf32, #tpu.memory_space<vmem>>, vector<8x32xf32>,
    %c7_i32_98 = arith.constant 7 : i32
    %cst_99 = arith.constant dense<0.000000e+00> : vector<8x128xf32>
    %356 = tpu.matmul %331, %8, %cst_99 {dimension_numbers = #tpu.dot_dimension_numbers<[1], [0], [0], [1], [0, 0, 1, 1], [], []>} : vector<8x32xf32>, vector<32x128xf32>, vector<8x128xf32> -> vector<8x128xf32>
    %cst_100 = arith.constant dense<0.000000e+00> : vector<8x128xf32>
    %357 = tpu.matmul %350, %9, %cst_100 {dimension_numbers = #tpu.dot_dimension_numbers<[1], [0], [0], [1], [0, 0, 1, 1], [], []>} : vector<8x32xf32>, vector<32x128xf32>, vector<8x128xf32> -> vector<8x128xf32>
    %358 = arith.addf %356, %357 : vector<8x128xf32>
    %359 = arith.addf %358, %12 : vector<8x128xf32>
    %360 = arith.negf %359 : vector<8x128xf32>
    %361 = math.exp %360 : vector<8x128xf32>
    %cst_101 = arith.constant 1.000000e+00 : f32
    %362 = vector.broadcast %cst_101 : f32 to vector<8x128xf32>
    %363 = arith.addf %362, %361 : vector<8x128xf32>
    %364 = arith.divf %362, %363 : vector<8x128xf32>
    %365 = math.tanh %359 : vector<8x128xf32>
    %366 = vector.extract_strided_slice %364 {offsets = [0, 0], sizes = [8, 32], strides = [1, 1]} : vector<8x128xf32> to vector<8x32xf32>
    %367 = vector.extract_strided_slice %364 {offsets = [0, 32], sizes = [8, 32], strides = [1, 1]} : vector<8x128xf32> to vector<8x32xf32>
    %368 = vector.extract_strided_slice %364 {offsets = [0, 64], sizes = [8, 32], strides = [1, 1]} : vector<8x128xf32> to vector<8x32xf32>
    %369 = vector.extract_strided_slice %365 {offsets = [0, 96], sizes = [8, 32], strides = [1, 1]} : vector<8x128xf32> to vector<8x32xf32>
    %370 = arith.mulf %367, %348 : vector<8x32xf32>
    %371 = arith.mulf %366, %369 : vector<8x32xf32>
    %372 = arith.addf %370, %371 : vector<8x32xf32>
    %373 = math.tanh %372 : vector<8x32xf32>
    %374 = arith.mulf %368, %373 : vector<8x32xf32>
    %c56_i32 = arith.constant 56 : i32
    %375 = tpu.assume_multiple %c56_i32, 8 : i32
    %376 = arith.index_cast %375 : i32 to index
    %c0_102 = arith.constant 0 : index
    %377 = vector.load %arg14[%376, %c0_102] : memref<64x32xf32, #tpu.memory_space<vmem>>, vector<8x32xf32>
    tpu.vector_store %arg14[%376, %c0_102], %374 {strides = array<i32>} : memref<64x32xf32, #tpu.memory_space<vmem>>, vector<8x32xf32>,
    %c0_103 = arith.constant 0 : index
    %c0_104 = arith.constant 0 : index
    %378 = vector.load %arg14[%c0_103, %c0_104] : memref<64x32xf32, #tpu.memory_space<vmem>>, vector<64x32xf32>
    %c0_105 = arith.constant 0 : index
    %c0_106 = arith.constant 0 : index
    %379 = vector.load %arg9[%c0_105, %c0_106] : memref<32x128xf32, #tpu.memory_space<vmem>>, vector<32x128xf32>
    %cst_107 = arith.constant dense<0.000000e+00> : vector<64x128xf32>
    %380 = tpu.matmul %378, %379, %cst_107 {dimension_numbers = #tpu.dot_dimension_numbers<[1], [0], [0], [1], [0, 0, 1, 1], [], []>} : vector<64x32xf32>, vector<32x128xf32>, vector<64x128xf32> -> vector<64x128xf32>
    %c0_108 = arith.constant 0 : index
    %c0_109 = arith.constant 0 : index
    %381 = vector.load %arg10[%c0_108, %c0_109] : memref<1x128xf32, #tpu.memory_space<vmem>>, vector<1x128xf32>
    %382 = vector.broadcast %381 : vector<1x128xf32> to vector<64x128xf32>
    %383 = arith.addf %380, %382 : vector<64x128xf32>
    %384 = math.tanh %383 : vector<64x128xf32>
    %cst_110 = arith.constant 8.000000e+01 : f32
    %385 = vector.broadcast %cst_110 : f32 to vector<64x128xf32>
    %386 = arith.mulf %384, %385 : vector<64x128xf32>
    %c0_111 = arith.constant 0 : index
    %c0_112 = arith.constant 0 : index
    %387 = vector.load %arg11[%c0_111, %c0_112] : memref<64x128xf32, #tpu.memory_space<vmem>>, vector<64x128xf32>
    tpu.vector_store %arg11[%c0_111, %c0_112], %386 {strides = array<i32>} : memref<64x128xf32, #tpu.memory_space<vmem>>, vector<64x128xf32>,
    %388 = tpu.concatenate %331, %374, %329, %372 in 1 : vector<8x32xf32>, vector<8x32xf32>, vector<8x32xf32>, vector<8x32xf32> -> vector<8x128xf32>
    %c0_113 = arith.constant 0 : index
    %c0_114 = arith.constant 0 : index
    %389 = vector.load %arg12[%c0_113, %c0_114] : memref<8x128xf32, #tpu.memory_space<vmem>>, vector<8x128xf32>
    tpu.vector_store %arg12[%c0_113, %c0_114], %388 {strides = array<i32>} : memref<8x128xf32, #tpu.memory_space<vmem>>, vector<8x128xf32>,
    return
  }
}

</mosaic_0001>

<bundles_post_ra>
// kernel: tpu_custom_call.1
= control target key start
LH: loop header
LB: loop body
LE: loop exit
PB: predicated region body
PF: predicated region fallthrough
CT: control target
= control target key end

     0   :  { %18 = vsyncpa [#allocation5], 0  ;;  %s4209_s0 = inlined_call_operand.vmem [shape: f32[64,4], index: 0, kind: input, shape index: {}]   ;;  %s4210_s1 = inlined_call_operand.hbm [shape: f32[2,8,32], index: 1, kind: input, shape index: {}]   ;;  %s4211_s2 = inlined_call_operand.hbm [shape: f32[2,8,32], index: 2, kind: input, shape index: {}]   ;;  %s4212_s3 = inlined_call_operand.vmem [shape: f32[4,128], index: 3, kind: input, shape index: {}]   ;;  %s4213_s4 = inlined_call_operand.vmem [shape: f32[32,128], index: 4, kind: input, shape index: {}]   ;;  %s4214_s5 = inlined_call_operand.vmem [shape: f32[1,128], index: 5, kind: input, shape index: {}]   ;;  %s4215_s6 = inlined_call_operand.vmem [shape: f32[32,128], index: 6, kind: input, shape index: {}]   ;;  %s4216_s7 = inlined_call_operand.hbm [shape: f32[32,128], index: 7, kind: input, shape index: {}]   ;;  %s4217_s8 = inlined_call_operand.vmem [shape: f32[1,128], index: 8, kind: input, shape index: {}]   ;;  %s4218_s9 = inlined_call_operand.hbm [shape: f32[32,128], index: 9, kind: input, shape index: {}]   ;;  %s4219_s10 = inlined_call_operand.vmem [shape: f32[1,128], index: 10, kind: input, shape index: {}]   ;;  %s4220_s11 = inlined_call_operand.hbm [shape: f32[64,128], index: 11, kind: output, shape index: {0}]   ;;  %s4221_s12 = inlined_call_operand.hbm [shape: f32[8,128], index: 12, kind: output, shape index: {1}]  }
   0x1   :  { %19 = vsyncpa [#allocation8], 0 }
   0x2   :  { %20 = vsyncpa [#allocation11], 0 }
   0x3   :  { %21 = vsyncpa [#allocation6], 0 }
   0x4   :  { %22 = vsyncpa [#allocation14], 0  ;;  %s3516_s21 = smov [#allocation7]   ;;  %s3517_s23 = smov [#allocation4]  }
   0x5   :  { %s42_s22 = sshll.u32 %s3516_s21, 4  ;;  %s30_s24 = sshll.u32 %s3517_s23, 4  ;;  %s43_s22 = int_to_ptr.vmem [resolvable:$true] %s42_s22  ;;  %s31_s24 = int_to_ptr.vmem [resolvable:$true] %s30_s24 }
   0x6   :  { %s3394_s25 = scalar_lea.vmem %s43_s22, 256  ;;  %p3399_p1 = scmp.lt.s32.totalorder %s43_s22, %s43_s22 }
   0x7   :  { %p3395_p0 = scmp.ne.s32.totalorder %s43_s22, %s3394_s25  ;;  %p3400_p2 = scmp.lt.s32.totalorder %s3394_s25, %s3394_s25 }
   0x9   :  { %p3401_p3 = por %p3400_p2, %p3399_p1 }
   0xb   :  { %p3402_p4 = pnand %p3401_p3, %p3395_p0 }
   0xd   :  { %3405 = shalt.err (!%p3402_p4)
}
   0xe   :  { %s3518_s26 = smov 128   ;;  %s3519_s27 = smov 8  }
   0xf   :  { %48 = dma.hbm_to_vmem [thread:$0]  %s4211_s2, 256, %s43_s22, [#allocation8], %s3518_s26, %s3518_s26, %s3519_s27  }
  0x10   :  { %s3414_s30 = scalar_lea.vmem %s31_s24, 256  ;;  %p3419_p6 = scmp.lt.s32.totalorder %s31_s24, %s31_s24 }
  0x11   :  { %p3415_p5 = scmp.ne.s32.totalorder %s31_s24, %s3414_s30  ;;  %p3420_p7 = scmp.lt.s32.totalorder %s3414_s30, %s3414_s30 }
  0x13   :  { %p3421_p8 = por %p3420_p7, %p3419_p6 }
  0x15   :  { %p3422_p9 = pnand %p3421_p8, %p3415_p5 }
  0x17   :  { %3425 = shalt.err (!%p3422_p9)
}
  0x18   :  { %36 = dma.hbm_to_vmem [thread:$0]  %s4210_s1, 256, %s31_s24, [#allocation5], %s3518_s26, %s3518_s26, %s3519_s27  }
  0x19   :  { %s3520_s15 = smov [#allocation9]   ;;  %s3521_s17 = smov [#allocation10]  }
  0x1a   :  { %s62_s16 = sshll.u32 %s3520_s15, 4  ;;  %s76_s18 = sshll.u32 %s3521_s17, 4  ;;  %s63_s16 = int_to_ptr.vmem [resolvable:$true] %s62_s16  ;;  %s77_s18 = int_to_ptr.vmem [resolvable:$true] %s76_s18 }
  0x1b   :  { %s3434_s2 = scalar_lea.vmem %s63_s16, 512  ;;  %p3439_p11 = scmp.lt.s32.totalorder %s63_s16, %s63_s16 }
  0x1c   :  { %p3435_p10 = scmp.ne.s32.totalorder %s63_s16, %s3434_s2  ;;  %p3440_p12 = scmp.lt.s32.totalorder %s3434_s2, %s3434_s2 }
  0x1e   :  { %p3441_p13 = por %p3440_p12, %p3439_p11 }
  0x20   :  { %p3442_p0 = pnand %p3441_p13, %p3435_p10 }
  0x22   :  { %3445 = shalt.err (!%p3442_p0)
}
  0x23   :  { %68 = dma.hbm_to_vmem [thread:$0]  %s4216_s7, 512, %s63_s16, [#allocation8], %s3518_s26, %s3518_s26, %s3519_s27  }
  0x24   :  { %s3454_s1 = scalar_lea.vmem %s77_s18, 512  ;;  %p3459_p2 = scmp.lt.s32.totalorder %s77_s18, %s77_s18 }
  0x25   :  { %p3455_p1 = scmp.ne.s32.totalorder %s77_s18, %s3454_s1  ;;  %p3460_p3 = scmp.lt.s32.totalorder %s3454_s1, %s3454_s1 }
  0x27   :  { %p3461_p4 = por %p3460_p3, %p3459_p2 }
  0x29   :  { %p3462_p5 = pnand %p3461_p4, %p3455_p1 }
  0x2b   :  { %3465 = shalt.err (!%p3462_p5)
}
  0x2c   :  { %82 = dma.hbm_to_vmem [thread:$0]  %s4218_s9, 512, %s77_s18, [#allocation11], %s3518_s26, %s3518_s26, %s3519_s27  }
  0x2d   :  { %3506 = dma.done.wait [#allocation5], 256  }
  0x2e   :  { %3507 = vsyncadd [#allocation5], 4294967040 }
  0x2f   :  { %3508 = dma.done.wait [#allocation8], 768  }
  0x30   :  { %3509 = vsyncadd [#allocation8], 4294966528 }
  0x31   :  { %3510 = dma.done.wait [#allocation11], 512  }
  0x32   :  { %3511 = vsyncadd [#allocation11], 4294966784  ;;  %vm138_vm0 = vcmask 1043456   ;;  %vm113_vm1 = vcmask 31744   ;;  %v105_v0 = vld [vmem:[%s4212_s3] sm:$0xf] }
  0x33   :  { %v101_v1 = vld [vmem:[%s4209_s0 + $0x20] sm:$0xff]  ;;  %v102_v2 = vld [vmem:[%s4209_s0 + $0x28] sm:$0xff]  ;;  %3213 = vmatprep.subr.msk.mxu1 %vm138_vm0, %v105_v0  ;;  %v3632_v3 = vld [vmem:[%s4213_s4 + $0x18] sm:$0xff]  ;;  %2915 = vmatprep.subr.msk.mxu0 %vm138_vm0, %v105_v0  ;;  %v3522_v5 = vmov 0.0   ;;  %vm3523_vm2 = vmmov 0   ;;  %vm281_vm3 = vcmask 261120  }
  0x34   :  { %2923 = vmatprep.mubr.msk.f32.mxu1 %vm113_vm1, %v101_v1  ;;  %3214 = vmatpush3.msk.msra.mxu1 %vm138_vm0, %v105_v0  ;;  %v97_v4 = vld [vmem:[%s4209_s0] sm:$0xff]  ;;  %v98_v6 = vld [vmem:[%s4209_s0 + $0x8] sm:$0xff]  ;;  %v103_v7 = vld [vmem:[%s4209_s0 + $0x30] sm:$0xff]  ;;  %s3524_s25 = smov 32   ;;  %vm2676_vm4 = vcmask 523264   ;;  %vm2678_vm5 = vcmask 785408  }
  0x35   :  { %2924 = vmatmul.mubr.msk.f32.vlgmr.msra.gmra.mxu1 %vm113_vm1, %v102_v2  ;;  %2929 = vmatprep.subr.mxu1 %v3522_v5  ;;  %v3652_v8 = vld [vmem:[%s4213_s4 + $0x10] sm:$0xff]  ;;  %v104_v9 = vld [vmem:[%s4209_s0 + $0x38] sm:$0xff]  ;;  %v3664_v10 = vld [vmem:[%s4213_s4 + $0x8] sm:$0xff] }
  0x36   :  { %2930 = vmatpush3.msra.mxu1 %v3632_v3  ;;  %2916 = vmatpush3.msk.msra.mxu0 %vm138_vm0, %v105_v0  ;;  %v3673_v11 = vld [vmem:[%s4213_s4] sm:$0xff]  ;;  %v279_v25 = vld [vmem:[#allocation7] sm:$0xff]  ;;  %v3714_v36 = vld [vmem:[#allocation9 + $0x18] sm:$0xff] }
  0x37   :  { %2917 = vmatprep.mubr.msk.f32.mxu0 %vm113_vm1, %v97_v4  ;;  %2931 = vmatprep.subr.mxu1 %v3522_v5  ;;  %v278_v12 = vld [vmem:[#allocation4] sm:$0xff]  ;;  %v99_v38 = vld [vmem:[%s4209_s0 + $0x10] sm:$0xff]  ;;  %v100_v40 = vld [vmem:[%s4209_s0 + $0x18] sm:$0xff]  ;;  %s3525_s0 = smov 64  }
  0x38   :  { %2918 = vmatmul.mubr.msk.f32.vlgmr.msra.gmra.mxu0 %vm113_vm1, %v98_v6  ;;  %2926 = vmatprep.mubr.msk.f32.mxu1 %vm113_vm1, %v103_v7  ;;  %v3703_v18 = vld [vmem:[%s4214_s5] ss:$0 sm:$0xff]  ;;  %v3722_v39 = vld [vmem:[#allocation9 + $0x10] sm:$0xff]  ;;  %v3731_v41 = vld [vmem:[#allocation9 + $0x8] sm:$0xff] }
  0x39   :  { %2932 = vmatpush3.msra.mxu1 %v3652_v8  ;;  %2951 = vmatprep.subr.mxu0 %v3522_v5  ;;  %v3737_v42 = vld [vmem:[#allocation9] sm:$0xff]  ;;  %v275_v43 = vld [vmem:[#allocation4 + $0x8] sm:$0xff]  ;;  %v3756_v46 = vld [vmem:[%s4215_s6 + $0x18] sm:$0xff] }
  0x3a   :  { %2927 = vmatmul.mubr.msk.f32.gmra.mxu1 %vm113_vm1, %v104_v9  ;;  %2933 = vmatprep.subr.mxu1 %v3522_v5  ;;  %v3762_v48 = vld [vmem:[%s4215_s6 + $0x10] sm:$0xff]  ;;  %v3771_v49 = vld [vmem:[%s4215_s6 + $0x8] sm:$0xff]  ;;  %v3778_v50 = vld [vmem:[%s4215_s6] sm:$0xff] }
  0x3b   :  { %2934 = vmatpush3.msra.mxu1 %v3664_v10  ;;  %2937 = vmatprep.mubr.msk.f32.mxu1 %vm3523_vm2, %v3522_v5  ;;  %v3804_v59 = vld [vmem:[%s4217_s8] ss:$0 sm:$0xff]  ;;  %v277_v2 = vld [vmem:[#allocation7 + $0x8] sm:$0xff] }
  0x3c   :  { %2935 = vmatprep.subr.mxu1 %v3522_v5  ;;  %2952 = vmatpush3.msra.mxu0 %v3714_v36 }
  0x3d   :  { %2936 = vmatpush3.msra.mxu1 %v3673_v11  ;;  %2953 = vmatprep.subr.mxu0 %v3522_v5 }
  0x3e   :  { %2938 = vmatmul.mubr.msk.f32.vlgmr.msra.gmra.mxu1 %vm281_vm3, %v278_v12  ;;  %2940 = vmatprep.subr.mxu1 %v3522_v5 }
  0x3f   :  { %2941 = vmatpush3.msra.mxu1 %v3632_v3  ;;  %2948 = vmatprep.mubr.msk.f32.mxu1 %vm3523_vm2, %v3522_v5 }
  0x40   :  { %2942 = vmatprep.subr.mxu1 %v3522_v5  ;;  %2920 = vmatprep.mubr.msk.f32.mxu0 %vm113_vm1, %v99_v38 }
  0x41   :  { %2943 = vmatpush3.msra.mxu1 %v3652_v8  ;;  %2954 = vmatpush3.msra.mxu0 %v3722_v39 }
  0x42   :  { %2944 = vmatprep.subr.mxu1 %v3522_v5  ;;  %2921 = vmatmul.mubr.msk.f32.gmra.mxu0 %vm113_vm1, %v100_v40 }
  0x43   :  { %2945 = vmatpush3.msra.mxu1 %v3664_v10  ;;  %2955 = vmatprep.subr.mxu0 %v3522_v5 }
  0x44   :  { %2946 = vmatprep.subr.mxu1 %v3522_v5  ;;  %2956 = vmatpush3.msra.mxu0 %v3731_v41 }
  0x45   :  { %2947 = vmatpush3.msra.mxu1 %v3673_v11  ;;  %2959 = vmatprep.mubr.msk.f32.mxu0 %vm3523_vm2, %v3522_v5 }
  0x46   :  { %2962 = vmatprep.subr.mxu1 %v3522_v5  ;;  %2957 = vmatprep.subr.mxu0 %v3522_v5 }
  0x47   :  { %2958 = vmatpush3.msra.mxu0 %v3737_v42 }
  0x48   :  { %2960 = vmatmul.mubr.msk.f32.vlgmr.msra.gmra.mxu0 %vm281_vm3, %v275_v43  ;;  %2973 = vmatprep.subr.mxu0 %v3522_v5 }
  0x49   :  { %2974 = vmatpush3.msra.mxu0 %v3632_v3  ;;  %2981 = vmatprep.mubr.msk.f32.mxu0 %vm3523_vm2, %v3522_v5 }
  0x4a   :  { %2975 = vmatprep.subr.mxu0 %v3522_v5 }
  0x4b   :  { %2976 = vmatpush3.msra.mxu0 %v3652_v8 }
  0x4c   :  { %2977 = vmatprep.subr.mxu0 %v3522_v5 }
  0x4d   :  { %2978 = vmatpush3.msra.mxu0 %v3664_v10 }
  0x4e   :  { %2979 = vmatprep.subr.mxu0 %v3522_v5 }
  0x4f   :  { %2980 = vmatpush3.msra.mxu0 %v3673_v11 }
  0x50   :  { %2995 = vmatprep.subr.mxu0 %v3522_v5 }
  0xf5   :  { %v3692_v13 = vpop.f32.mrf.mxu1 }
  0xf7   :  { %v3694_v14 = vpop.f32.mrf.mxu1 }
  0xf8   :  { %v3696_v15 = vpop.f32.mrf.mxu0 }
  0xf9   :  { %v214_v55 = vadd.f32 %v3696_v15, %v3703_v18 }
  0xfa   :  { %v3698_v16 = vpop.f32.mrf.mxu1  ;;  %v208_v17 = vpop.f32.mrf.mxu0 }
  0xfb   :  { %v209_v20 = vadd.f32 %v3703_v18, %v208_v17 }
  0xfc   :  { %v3705_v19 = vpop.f32.mrf.mxu1 }
  0xfe   :  { %v351_v21 = vpop.f32.mrf.mxu1 }
  0xff   :  { %v355_v22 = vadd.f32 %v351_v21, %v209_v20 }
 0x100   :  { %v2939_v23 = vpop.f32.mrf.mxu1 }
 0x101   :  { %3228 = vtanh.f32 %v355_v22  ;;  %v2726_v26 = vmul.f32 -1.442695, %v355_v22 }
 0x102   :  { %v3795_v51 = vpop.f32.mrf.mxu0 }
 0x103   :  { %3230 = vpow2.f32 %v2726_v26 }
 0x104   :  { %v3797_v52 = vpop.f32.mrf.mxu0 }
 0x108   :  { %v555_v53 = vpop.f32.mrf.mxu0 }
 0x10a   :  { %v2961_v54 = vpop.f32.mrf.mxu0 }
 0x10e   :  { %v3229_v24 = vpop.eup %3228 }
 0x10f   :  { %369 = vrot.lane.b32.xlu0 %v3229_v24, %s3524_s25 }
 0x110   :  { %v3231_v27 = vpop.eup %3230 }
 0x111   :  { %v359_v28 = vadd.f32 1.0, %v3231_v27 }
 0x113   :  { %364 = vrot.lane.b32.xlu0 %v279_v25, %s3524_s25  ;;  %3232 = vrcp.f32 %v359_v28 }
 0x120   :  { %v3233_v29 = vpop.eup %3232 }
 0x181   :  { %v370_v30 = vpop.permute.xlu0 %369 }
 0x182   :  { %v372_v31 = vmul.f32 %v3233_v29, %v370_v30 }
 0x184   :  { %374 = vrot.lane.b32.xlu1 %v372_v31, %s3524_s25 }
 0x185   :  { %v365_v32 = vpop.permute.xlu0 %364 }
 0x186   :  { %v367_v33 = vmul.f32 %v3233_v29, %v365_v32 }
 0x1f6   :  { %v375_v34 = vpop.permute.xlu1 %374 }
 0x1f7   :  { %v3711_v35 = vadd.f32 %v375_v34, %v367_v33 }
 0x1f9   :  { %3234 = vtanh.f32 %v3711_v35 }
 0x206   :  { %v3235_v37 = vpop.eup %3234 }
 0x207   :  { %380 = vrot.lane.b32.xlu1 %v3235_v37, %s3524_s25 }
 0x279   :  { %v381_v44 = vpop.permute.xlu1 %380 }
 0x27a   :  { %v383_v45 = vmul.f32 %v3233_v29, %v381_v44  ;;  %v219_v44 = vadd.f32 %v3703_v18, %v3797_v52 }
 0x27c   :  { %387 = vrot.lane.b32.xlu0 %v383_v45, %s3525_s0 }
 0x2ee   :  { %v388_v47 = vpop.permute.xlu0 %387 }
 0x2ef   :  { %2949 = vmatmul.mubr.msk.f32.vlgmr.msra.gmra.mxu1 %vm281_vm3, %v388_v47 }
 0x2f0   :  { %2963 = vmatpush3.msra.mxu1 %v3756_v46  ;;  %2970 = vmatprep.mubr.msk.f32.mxu1 %vm3523_vm2, %v3522_v5 }
 0x2f1   :  { %2964 = vmatprep.subr.mxu1 %v3522_v5 }
 0x2f2   :  { %2965 = vmatpush3.msra.mxu1 %v3762_v48 }
 0x2f3   :  { %2966 = vmatprep.subr.mxu1 %v3522_v5 }
 0x2f4   :  { %2967 = vmatpush3.msra.mxu1 %v3771_v49 }
 0x2f5   :  { %2968 = vmatprep.subr.mxu1 %v3522_v5 }
 0x2f6   :  { %2969 = vmatpush3.msra.mxu1 %v3778_v50 }
 0x2f7   :  { %2971 = vmatmul.mubr.msk.f32.vlgmr.msra.gmra.mxu1 %vm281_vm3, %v388_v47  ;;  %2984 = vmatprep.subr.mxu1 %v3522_v5 }
 0x2f8   :  { %2985 = vmatpush3.msra.mxu1 %v3714_v36  ;;  %2992 = vmatprep.mubr.msk.f32.mxu1 %vm3523_vm2, %v3522_v5 }
 0x2f9   :  { %2986 = vmatprep.subr.mxu1 %v3522_v5 }
 0x2fa   :  { %2987 = vmatpush3.msra.mxu1 %v3722_v39 }
 0x2fb   :  { %2988 = vmatprep.subr.mxu1 %v3522_v5 }
 0x2fc   :  { %2989 = vmatpush3.msra.mxu1 %v3731_v41 }
 0x2fd   :  { %2990 = vmatprep.subr.mxu1 %v3522_v5 }
 0x2fe   :  { %2991 = vmatpush3.msra.mxu1 %v3737_v42 }
 0x2ff   :  { %3006 = vmatprep.subr.mxu1 %v3522_v5 }
 0x3af   :  { %v457_v56 = vpop.f32.mrf.mxu1 }
 0x3b0   :  { %v461_v57 = vadd.f32 %v457_v56, %v214_v55 }
 0x3b1   :  { %v2950_v58 = vpop.f32.mrf.mxu1 }
 0x3b2   :  { %3236 = vtanh.f32 %v461_v57  ;;  %v2728_v4 = vmul.f32 -1.442695, %v461_v57 }
 0x3b7   :  { %v625_v60 = vpop.f32.mrf.mxu1 }
 0x3b8   :  { %v626_v61 = vadd.f32 %v625_v60, %v555_v53 }
 0x3b9   :  { %v2972_v62 = vpop.f32.mrf.mxu1 }
 0x3ba   :  { %v629_v63 = vadd.f32 %v3804_v59, %v626_v61 }
 0x3bc   :  { %3238 = vtanh.f32 %v629_v63  ;;  %v2731_v6 = vmul.f32 -1.442695, %v629_v63 }
 0x3bd   :  { %3240 = vpow2.f32 %v2728_v4 }
 0x3be   :  { %3242 = vpow2.f32 %v2731_v6 }
 0x3bf   :  { %v3237_v0 = vpop.eup %3236 }
 0x3c0   :  { %471 = vrot.lane.b32.xlu1 %v3237_v0, %s3524_s25 }
 0x3c9   :  { %v3239_v1 = vpop.eup %3238 }
 0x3ca   :  { %643 = vrot.lane.b32.xlu0 %v3239_v1, %s3524_s25  ;;  %v3241_v7 = vpop.eup %3240 }
 0x3cb   :  { %v465_v9 = vadd.f32 1.0, %v3241_v7  ;;  %v3243_v12 = vpop.eup %3242 }
 0x3cc   :  { %v633_v15 = vadd.f32 1.0, %v3243_v12 }
 0x3cd   :  { %3244 = vrcp.f32 %v465_v9 }
 0x3ce   :  { %638 = vrot.lane.b32.xlu0 %v277_v2, %s3524_s25  ;;  %3246 = vrcp.f32 %v633_v15 }
 0x3da   :  { %v3245_v17 = vpop.eup %3244 }
 0x3db   :  { %v3247_v22 = vpop.eup %3246  ;;  %v469_v25 = vmul.f32 %v3245_v17, %v3711_v35 }
 0x432   :  { %v472_v20 = vpop.permute.xlu1 %471 }
 0x433   :  { %v474_v21 = vmul.f32 %v3245_v17, %v472_v20 }
 0x435   :  { %476 = vrot.lane.b32.xlu1 %v474_v21, %s3524_s25 }
 0x43c   :  { %v644_v23 = vpop.permute.xlu0 %643 }
 0x43d   :  { %v646_v24 = vmul.f32 %v3247_v22, %v644_v23 }
 0x43f   :  { %648 = vrot.lane.b32.xlu1 %v646_v24, %s3524_s25 }
 0x440   :  { %v639_v28 = vpop.permute.xlu0 %638 }
 0x441   :  { %v641_v29 = vmul.f32 %v3247_v22, %v639_v28 }
 0x4a7   :  { %v477_v26 = vpop.permute.xlu1 %476 }
 0x4a8   :  { %v3813_v27 = vadd.f32 %v477_v26, %v469_v25 }
 0x4aa   :  { %3248 = vtanh.f32 %v3813_v27 }
 0x4b1   :  { %v649_v30 = vpop.permute.xlu1 %648 }
 0x4b2   :  { %v3816_v31 = vadd.f32 %v649_v30, %v641_v29 }
 0x4b4   :  { %3250 = vtanh.f32 %v3816_v31 }
 0x4b7   :  { %v3249_v32 = vpop.eup %3248 }
 0x4b8   :  { %482 = vrot.lane.b32.xlu0 %v3249_v32, %s3524_s25 }
 0x4c1   :  { %v3251_v33 = vpop.eup %3250 }
 0x4c2   :  { %654 = vrot.lane.b32.xlu1 %v3251_v33, %s3524_s25 }
 0x52a   :  { %v483_v34 = vpop.permute.xlu0 %482 }
 0x52b   :  { %v485_v35 = vmul.f32 %v3245_v17, %v483_v34  ;;  %v224_v34 = vadd.f32 %v3795_v51, %v3703_v18 }
 0x52d   :  { %666 = vrot.lane.b32.xlu0 %v485_v35, %s3525_s0 }
 0x534   :  { %v655_v37 = vpop.permute.xlu1 %654 }
 0x535   :  { %v657_v38 = vmul.f32 %v3247_v22, %v655_v37 }
 0x537   :  { %659 = vrot.lane.b32.xlu1 %v657_v38, %s3525_s0 }
 0x59f   :  { %v667_v40 = vpop.permute.xlu0 %666 }
 0x5a0   :  { %2982 = vmatmul.mubr.msk.f32.vlgmr.msra.gmra.mxu0 %vm281_vm3, %v667_v40 }
 0x5a1   :  { %2996 = vmatpush3.msra.mxu0 %v3756_v46  ;;  %3003 = vmatprep.mubr.msk.f32.mxu0 %vm3523_vm2, %v3522_v5 }
 0x5a2   :  { %2997 = vmatprep.subr.mxu0 %v3522_v5 }
 0x5a3   :  { %2998 = vmatpush3.msra.mxu0 %v3762_v48 }
 0x5a4   :  { %2999 = vmatprep.subr.mxu0 %v3522_v5 }
 0x5a5   :  { %3000 = vmatpush3.msra.mxu0 %v3771_v49 }
 0x5a6   :  { %3001 = vmatprep.subr.mxu0 %v3522_v5 }
 0x5a7   :  { %3002 = vmatpush3.msra.mxu0 %v3778_v50 }
 0x5a8   :  { %3004 = vmatmul.mubr.msk.f32.vlgmr.msra.gmra.mxu0 %vm281_vm3, %v667_v40  ;;  %3017 = vmatprep.subr.mxu0 %v3522_v5 }
 0x5a9   :  { %v660_v43 = vpop.permute.xlu1 %659  ;;  %3018 = vmatpush3.msra.mxu0 %v3714_v36  ;;  %3025 = vmatprep.mubr.msk.f32.mxu0 %vm3523_vm2, %v3522_v5 }
 0x5aa   :  { %662 = vst.msk [vmem:[#allocation3] sm:$0xff] %vm281_vm3, %v660_v43  ;;  %2993 = vmatmul.mubr.msk.f32.vlgmr.msra.gmra.mxu1 %vm281_vm3, %v660_v43  ;;  %3019 = vmatprep.subr.mxu0 %v3522_v5 }
 0x5ab   :  { %3007 = vmatpush3.msra.mxu1 %v3632_v3  ;;  %3014 = vmatprep.mubr.msk.f32.mxu1 %vm3523_vm2, %v3522_v5 }
 0x5ac   :  { %3008 = vmatprep.subr.mxu1 %v3522_v5  ;;  %3020 = vmatpush3.msra.mxu0 %v3722_v39 }
 0x5ad   :  { %3009 = vmatpush3.msra.mxu1 %v3652_v8  ;;  %3021 = vmatprep.subr.mxu0 %v3522_v5 }
 0x5ae   :  { %3010 = vmatprep.subr.mxu1 %v3522_v5  ;;  %3022 = vmatpush3.msra.mxu0 %v3731_v41 }
 0x5af   :  { %3011 = vmatpush3.msra.mxu1 %v3664_v10  ;;  %3023 = vmatprep.subr.mxu0 %v3522_v5 }
 0x5b0   :  { %3012 = vmatprep.subr.mxu1 %v3522_v5  ;;  %3024 = vmatpush3.msra.mxu0 %v3737_v42 }
 0x5b1   :  { %3013 = vmatpush3.msra.mxu1 %v3673_v11  ;;  %3039 = vmatprep.subr.mxu0 %v3522_v5 }
 0x5b2   :  { %3028 = vmatprep.subr.mxu1 %v3522_v5 }
 0x660   :  { %v736_v45 = vpop.f32.mrf.mxu0 }
 0x661   :  { %v740_v47 = vadd.f32 %v736_v45, %v219_v44 }
 0x662   :  { %v2983_v53 = vpop.f32.mrf.mxu0 }
 0x663   :  { %3252 = vtanh.f32 %v740_v47  ;;  %v2733_v63 = vmul.f32 -1.442695, %v740_v47 }
 0x668   :  { %v903_v54 = vpop.f32.mrf.mxu0 }
 0x66a   :  { %v833_v55 = vpop.f32.mrf.mxu1  ;;  %v3005_v56 = vpop.f32.mrf.mxu0 }
 0x66b   :  { %v904_v57 = vadd.f32 %v903_v54, %v833_v55 }
 0x66c   :  { %v2994_v58 = vpop.f32.mrf.mxu1 }
 0x66d   :  { %v907_v60 = vadd.f32 %v3804_v59, %v904_v57 }
 0x66f   :  { %3254 = vtanh.f32 %v907_v60  ;;  %v2736_v52 = vmul.f32 -1.442695, %v907_v60 }
 0x670   :  { %v3253_v61 = vpop.eup %3252  ;;  %3256 = vpow2.f32 %v2733_v63 }
 0x671   :  { %750 = vrot.lane.b32.xlu0 %v3253_v61, %s3524_s25  ;;  %3258 = vpow2.f32 %v2736_v52 }
 0x67c   :  { %v3255_v62 = vpop.eup %3254 }
 0x67d   :  { %917 = vrot.lane.b32.xlu1 %v3255_v62, %s3524_s25  ;;  %v3257_v0 = vpop.eup %3256 }
 0x67e   :  { %v744_v1 = vadd.f32 1.0, %v3257_v0  ;;  %v3259_v2 = vpop.eup %3258 }
 0x67f   :  { %v911_v4 = vadd.f32 1.0, %v3259_v2 }
 0x680   :  { %3260 = vrcp.f32 %v744_v1 }
 0x681   :  { %3262 = vrcp.f32 %v911_v4 }
 0x68d   :  { %v3261_v6 = vpop.eup %3260 }
 0x68e   :  { %v3263_v12 = vpop.eup %3262  ;;  %v748_v20 = vmul.f32 %v3261_v6, %v3813_v27 }
 0x68f   :  { %v915_v23 = vmul.f32 %v3263_v12, %v3816_v31 }
 0x6e3   :  { %v751_v7 = vpop.permute.xlu0 %750 }
 0x6e4   :  { %v753_v9 = vmul.f32 %v3261_v6, %v751_v7 }
 0x6e6   :  { %755 = vrot.lane.b32.xlu0 %v753_v9, %s3524_s25 }
 0x6ef   :  { %v918_v15 = vpop.permute.xlu1 %917 }
 0x6f0   :  { %v920_v17 = vmul.f32 %v3263_v12, %v918_v15 }
 0x6f2   :  { %922 = vrot.lane.b32.xlu1 %v920_v17, %s3524_s25 }
 0x758   :  { %v756_v21 = vpop.permute.xlu0 %755 }
 0x759   :  { %v3865_v22 = vadd.f32 %v756_v21, %v748_v20 }
 0x75b   :  { %3264 = vtanh.f32 %v3865_v22 }
 0x764   :  { %v923_v24 = vpop.permute.xlu1 %922 }
 0x765   :  { %v3869_v25 = vadd.f32 %v923_v24, %v915_v23 }
 0x767   :  { %3266 = vtanh.f32 %v3869_v25 }
 0x768   :  { %v3265_v26 = vpop.eup %3264 }
 0x769   :  { %761 = vrot.lane.b32.xlu0 %v3265_v26, %s3524_s25 }
 0x774   :  { %v3267_v28 = vpop.eup %3266 }
 0x775   :  { %928 = vrot.lane.b32.xlu1 %v3267_v28, %s3524_s25  ;;  %v229_v28 = vadd.f32 %v3703_v18, %v3694_v14 }
 0x7db   :  { %v762_v29 = vpop.permute.xlu0 %761 }
 0x7dc   :  { %v764_v27 = vmul.f32 %v3261_v6, %v762_v29 }
 0x7de   :  { %941 = vrot.lane.b32.xlu0 %v764_v27, %s3525_s0 }
 0x7e7   :  { %v929_v30 = vpop.permute.xlu1 %928 }
 0x7e8   :  { %v931_v32 = vmul.f32 %v3263_v12, %v929_v30 }
 0x7ea   :  { %933 = vrot.lane.b32.xlu1 %v931_v32, %s3525_s0 }
 0x850   :  { %v942_v31 = vpop.permute.xlu0 %941 }
 0x851   :  { %3015 = vmatmul.mubr.msk.f32.vlgmr.msra.gmra.mxu1 %vm281_vm3, %v942_v31 }
 0x852   :  { %3029 = vmatpush3.msra.mxu1 %v3756_v46  ;;  %3036 = vmatprep.mubr.msk.f32.mxu1 %vm3523_vm2, %v3522_v5 }
 0x853   :  { %3030 = vmatprep.subr.mxu1 %v3522_v5 }
 0x854   :  { %3031 = vmatpush3.msra.mxu1 %v3762_v48 }
 0x855   :  { %3032 = vmatprep.subr.mxu1 %v3522_v5 }
 0x856   :  { %3033 = vmatpush3.msra.mxu1 %v3771_v49 }
 0x857   :  { %3034 = vmatprep.subr.mxu1 %v3522_v5 }
 0x858   :  { %3035 = vmatpush3.msra.mxu1 %v3778_v50 }
 0x859   :  { %3037 = vmatmul.mubr.msk.f32.vlgmr.msra.gmra.mxu1 %vm281_vm3, %v942_v31  ;;  %3050 = vmatprep.subr.mxu1 %v3522_v5 }
 0x85a   :  { %3051 = vmatpush3.msra.mxu1 %v3714_v36  ;;  %3058 = vmatprep.mubr.msk.f32.mxu1 %vm3523_vm2, %v3522_v5 }
 0x85b   :  { %3052 = vmatprep.subr.mxu1 %v3522_v5 }
 0x85c   :  { %v934_v33 = vpop.permute.xlu1 %933  ;;  %3053 = vmatpush3.msra.mxu1 %v3722_v39 }
 0x85d   :  { %937 = vst.msk [vmem:[#allocation3 + $0x8] sm:$0xff] %vm281_vm3, %v934_v33  ;;  %3026 = vmatmul.mubr.msk.f32.vlgmr.msra.gmra.mxu0 %vm281_vm3, %v934_v33  ;;  %3054 = vmatprep.subr.mxu1 %v3522_v5 }
 0x85e   :  { %3040 = vmatpush3.msra.mxu0 %v3632_v3  ;;  %3047 = vmatprep.mubr.msk.f32.mxu0 %vm3523_vm2, %v3522_v5 }
 0x85f   :  { %3041 = vmatprep.subr.mxu0 %v3522_v5  ;;  %3055 = vmatpush3.msra.mxu1 %v3731_v41 }
 0x860   :  { %3042 = vmatpush3.msra.mxu0 %v3652_v8  ;;  %3056 = vmatprep.subr.mxu1 %v3522_v5 }
 0x861   :  { %3043 = vmatprep.subr.mxu0 %v3522_v5  ;;  %3057 = vmatpush3.msra.mxu1 %v3737_v42 }
 0x862   :  { %3044 = vmatpush3.msra.mxu0 %v3664_v10  ;;  %3072 = vmatprep.subr.mxu1 %v3522_v5 }
 0x863   :  { %3045 = vmatprep.subr.mxu0 %v3522_v5 }
 0x864   :  { %3046 = vmatpush3.msra.mxu0 %v3673_v11 }
 0x865   :  { %3061 = vmatprep.subr.mxu0 %v3522_v5 }
 0x911   :  { %v1011_v35 = vpop.f32.mrf.mxu1 }
 0x912   :  { %v1015_v37 = vadd.f32 %v1011_v35, %v224_v34 }
 0x913   :  { %v3016_v38 = vpop.f32.mrf.mxu1 }
 0x914   :  { %3268 = vtanh.f32 %v1015_v37  ;;  %v2738_v56 = vmul.f32 -1.442695, %v1015_v37 }
 0x919   :  { %v1178_v40 = vpop.f32.mrf.mxu1 }
 0x91b   :  { %v3038_v43 = vpop.f32.mrf.mxu1 }
 0x91d   :  { %v1108_v44 = vpop.f32.mrf.mxu0 }
 0x91e   :  { %v1179_v45 = vadd.f32 %v1178_v40, %v1108_v44 }
 0x91f   :  { %v3027_v47 = vpop.f32.mrf.mxu0 }
 0x920   :  { %v1182_v53 = vadd.f32 %v3804_v59, %v1179_v45 }
 0x921   :  { %v3269_v54 = vpop.eup %3268 }
 0x922   :  { %3270 = vtanh.f32 %v1182_v53  ;;  %1025 = vrot.lane.b32.xlu0 %v3269_v54, %s3524_s25  ;;  %v2741_v51 = vmul.f32 -1.442695, %v1182_v53 }
 0x923   :  { %3272 = vpow2.f32 %v2738_v56 }
 0x924   :  { %3274 = vpow2.f32 %v2741_v51 }
 0x92f   :  { %v3271_v55 = vpop.eup %3270 }
 0x930   :  { %1192 = vrot.lane.b32.xlu1 %v3271_v55, %s3524_s25  ;;  %v3273_v57 = vpop.eup %3272 }
 0x931   :  { %v1019_v58 = vadd.f32 1.0, %v3273_v57  ;;  %v3275_v60 = vpop.eup %3274 }
 0x932   :  { %v1186_v61 = vadd.f32 1.0, %v3275_v60 }
 0x933   :  { %3276 = vrcp.f32 %v1019_v58 }
 0x934   :  { %3278 = vrcp.f32 %v1186_v61 }
 0x940   :  { %v3277_v62 = vpop.eup %3276 }
 0x941   :  { %v3279_v0 = vpop.eup %3278  ;;  %v1023_v4 = vmul.f32 %v3277_v62, %v3865_v22 }
 0x942   :  { %v1190_v9 = vmul.f32 %v3279_v0, %v3869_v25 }
 0x994   :  { %v1026_v63 = vpop.permute.xlu0 %1025 }
 0x995   :  { %v1028_v52 = vmul.f32 %v3277_v62, %v1026_v63 }
 0x997   :  { %1030 = vrot.lane.b32.xlu0 %v1028_v52, %s3524_s25 }
 0x9a2   :  { %v1193_v1 = vpop.permute.xlu1 %1192 }
 0x9a3   :  { %v1195_v2 = vmul.f32 %v3279_v0, %v1193_v1 }
 0x9a5   :  { %1197 = vrot.lane.b32.xlu1 %v1195_v2, %s3524_s25 }
 0xa09   :  { %v1031_v6 = vpop.permute.xlu0 %1030 }
 0xa0a   :  { %v3918_v7 = vadd.f32 %v1031_v6, %v1023_v4 }
 0xa0c   :  { %3280 = vtanh.f32 %v3918_v7 }
 0xa17   :  { %v1198_v12 = vpop.permute.xlu1 %1197 }
 0xa18   :  { %v3922_v15 = vadd.f32 %v1198_v12, %v1190_v9 }
 0xa19   :  { %v3281_v17 = vpop.eup %3280 }
 0xa1a   :  { %3282 = vtanh.f32 %v3922_v15  ;;  %1036 = vrot.lane.b32.xlu0 %v3281_v17, %s3524_s25 }
 0xa27   :  { %v3283_v20 = vpop.eup %3282 }
 0xa28   :  { %1203 = vrot.lane.b32.xlu1 %v3283_v20, %s3524_s25 }
 0xa8c   :  { %v1037_v21 = vpop.permute.xlu0 %1036 }
 0xa8d   :  { %v1039_v22 = vmul.f32 %v3277_v62, %v1037_v21 }
 0xa8f   :  { %1216 = vrot.lane.b32.xlu0 %v1039_v22, %s3525_s0 }
 0xa9a   :  { %v1204_v23 = vpop.permute.xlu1 %1203 }
 0xa9b   :  { %v1206_v24 = vmul.f32 %v3279_v0, %v1204_v23 }
 0xa9d   :  { %1208 = vrot.lane.b32.xlu1 %v1206_v24, %s3525_s0 }
 0xb01   :  { %v1217_v25 = vpop.permute.xlu0 %1216 }
 0xb02   :  { %3048 = vmatmul.mubr.msk.f32.vlgmr.msra.gmra.mxu0 %vm281_vm3, %v1217_v25 }
 0xb03   :  { %3062 = vmatpush3.msra.mxu0 %v3756_v46  ;;  %3069 = vmatprep.mubr.msk.f32.mxu0 %vm3523_vm2, %v3522_v5 }
 0xb04   :  { %3063 = vmatprep.subr.mxu0 %v3522_v5 }
 0xb05   :  { %3064 = vmatpush3.msra.mxu0 %v3762_v48 }
 0xb06   :  { %3065 = vmatprep.subr.mxu0 %v3522_v5 }
 0xb07   :  { %3066 = vmatpush3.msra.mxu0 %v3771_v49 }
 0xb08   :  { %3067 = vmatprep.subr.mxu0 %v3522_v5 }
 0xb09   :  { %3068 = vmatpush3.msra.mxu0 %v3778_v50 }
 0xb0a   :  { %3070 = vmatmul.mubr.msk.f32.vlgmr.msra.gmra.mxu0 %vm281_vm3, %v1217_v25  ;;  %3083 = vmatprep.subr.mxu0 %v3522_v5 }
 0xb0b   :  { %3084 = vmatpush3.msra.mxu0 %v3714_v36  ;;  %3091 = vmatprep.mubr.msk.f32.mxu0 %vm3523_vm2, %v3522_v5 }
 0xb0c   :  { %3085 = vmatprep.subr.mxu0 %v3522_v5 }
 0xb0d   :  { %3086 = vmatpush3.msra.mxu0 %v3722_v39 }
 0xb0e   :  { %3087 = vmatprep.subr.mxu0 %v3522_v5 }
 0xb0f   :  { %v1209_v26 = vpop.permute.xlu1 %1208  ;;  %3088 = vmatpush3.msra.mxu0 %v3731_v41 }
 0xb10   :  { %1212 = vst.msk [vmem:[#allocation3 + $0x10] sm:$0xff] %vm281_vm3, %v1209_v26  ;;  %3059 = vmatmul.mubr.msk.f32.vlgmr.msra.gmra.mxu1 %vm281_vm3, %v1209_v26  ;;  %3089 = vmatprep.subr.mxu0 %v3522_v5 }
 0xb11   :  { %3073 = vmatpush3.msra.mxu1 %v3632_v3  ;;  %3080 = vmatprep.mubr.msk.f32.mxu1 %vm3523_vm2, %v3522_v5 }
 0xb12   :  { %3074 = vmatprep.subr.mxu1 %v3522_v5  ;;  %3090 = vmatpush3.msra.mxu0 %v3737_v42 }
 0xb13   :  { %3075 = vmatpush3.msra.mxu1 %v3652_v8  ;;  %3105 = vmatprep.subr.mxu0 %v3522_v5 }
 0xb14   :  { %3076 = vmatprep.subr.mxu1 %v3522_v5 }
 0xb15   :  { %3077 = vmatpush3.msra.mxu1 %v3664_v10 }
 0xb16   :  { %3078 = vmatprep.subr.mxu1 %v3522_v5 }
 0xb17   :  { %3079 = vmatpush3.msra.mxu1 %v3673_v11 }
 0xb18   :  { %3094 = vmatprep.subr.mxu1 %v3522_v5 }
 0xbc2   :  { %v1286_v29 = vpop.f32.mrf.mxu0 }
 0xbc3   :  { %v1290_v27 = vadd.f32 %v1286_v29, %v229_v28 }
 0xbc4   :  { %v3049_v30 = vpop.f32.mrf.mxu0 }
 0xbc5   :  { %3284 = vtanh.f32 %v1290_v27  ;;  %v2743_v43 = vmul.f32 -1.442695, %v1290_v27 }
 0xbca   :  { %v1453_v32 = vpop.f32.mrf.mxu0 }
 0xbcc   :  { %v3071_v31 = vpop.f32.mrf.mxu0 }
 0xbd0   :  { %v1383_v33 = vpop.f32.mrf.mxu1 }
 0xbd1   :  { %v1454_v34 = vadd.f32 %v1453_v32, %v1383_v33 }
 0xbd2   :  { %v3285_v35 = vpop.eup %3284  ;;  %v3060_v37 = vpop.f32.mrf.mxu1 }
 0xbd3   :  { %v1457_v38 = vadd.f32 %v3804_v59, %v1454_v34  ;;  %1300 = vrot.lane.b32.xlu0 %v3285_v35, %s3524_s25 }
 0xbd5   :  { %3286 = vtanh.f32 %v1457_v38  ;;  %v2746_v14 = vmul.f32 -1.442695, %v1457_v38 }
 0xbd6   :  { %3288 = vpow2.f32 %v2743_v43 }
 0xbd7   :  { %3290 = vpow2.f32 %v2746_v14 }
 0xbe2   :  { %v3287_v40 = vpop.eup %3286 }
 0xbe3   :  { %1467 = vrot.lane.b32.xlu1 %v3287_v40, %s3524_s25  ;;  %v3289_v44 = vpop.eup %3288 }
 0xbe4   :  { %v1294_v45 = vadd.f32 1.0, %v3289_v44  ;;  %v3291_v47 = vpop.eup %3290 }
 0xbe5   :  { %v1461_v53 = vadd.f32 1.0, %v3291_v47 }
 0xbe6   :  { %3292 = vrcp.f32 %v1294_v45 }
 0xbe7   :  { %3294 = vrcp.f32 %v1461_v53 }
 0xbf3   :  { %v3293_v54 = vpop.eup %3292 }
 0xbf4   :  { %v3295_v51 = vpop.eup %3294  ;;  %v1298_v60 = vmul.f32 %v3293_v54, %v3918_v7 }
 0xbf5   :  { %v1465_v63 = vmul.f32 %v3295_v51, %v3922_v15 }
 0xc45   :  { %v1301_v55 = vpop.permute.xlu0 %1300 }
 0xc46   :  { %v1303_v56 = vmul.f32 %v3293_v54, %v1301_v55 }
 0xc48   :  { %1305 = vrot.lane.b32.xlu0 %v1303_v56, %s3524_s25 }
 0xc55   :  { %v1468_v57 = vpop.permute.xlu1 %1467 }
 0xc56   :  { %v1470_v58 = vmul.f32 %v3295_v51, %v1468_v57 }
 0xc58   :  { %1472 = vrot.lane.b32.xlu1 %v1470_v58, %s3524_s25 }
 0xcba   :  { %v1306_v61 = vpop.permute.xlu0 %1305 }
 0xcbb   :  { %v3971_v62 = vadd.f32 %v1306_v61, %v1298_v60  ;;  %v4080_v60 = vld [vmem:[%s4214_s5] ss:$0 sm:$0xff] }
 0xcbc   :  { %v239_v61 = vadd.f32 %v4080_v60, %v3705_v19 }
 0xcbd   :  { %3296 = vtanh.f32 %v3971_v62 }
 0xcca   :  { %v3297_v52 = vpop.eup %3296  ;;  %v1473_v0 = vpop.permute.xlu1 %1472 }
 0xccb   :  { %v3975_v1 = vadd.f32 %v1473_v0, %v1465_v63  ;;  %1311 = vrot.lane.b32.xlu0 %v3297_v52, %s3524_s25 }
 0xccd   :  { %3298 = vtanh.f32 %v3975_v1 }
 0xcda   :  { %v3299_v2 = vpop.eup %3298 }
 0xcdb   :  { %1478 = vrot.lane.b32.xlu1 %v3299_v2, %s3524_s25 }
 0xd3d   :  { %v1312_v4 = vpop.permute.xlu0 %1311 }
 0xd3e   :  { %v1314_v6 = vmul.f32 %v3293_v54, %v1312_v4 }
 0xd40   :  { %1491 = vrot.lane.b32.xlu0 %v1314_v6, %s3525_s0 }
 0xd4d   :  { %v1479_v7 = vpop.permute.xlu1 %1478 }
 0xd4e   :  { %v1481_v9 = vmul.f32 %v3295_v51, %v1479_v7 }
 0xd50   :  { %1483 = vrot.lane.b32.xlu1 %v1481_v9, %s3525_s0 }
 0xdb2   :  { %v1492_v12 = vpop.permute.xlu0 %1491 }
 0xdb3   :  { %3081 = vmatmul.mubr.msk.f32.vlgmr.msra.gmra.mxu1 %vm281_vm3, %v1492_v12 }
 0xdb4   :  { %3095 = vmatpush3.msra.mxu1 %v3756_v46  ;;  %3102 = vmatprep.mubr.msk.f32.mxu1 %vm3523_vm2, %v3522_v5 }
 0xdb5   :  { %3096 = vmatprep.subr.mxu1 %v3522_v5 }
 0xdb6   :  { %3097 = vmatpush3.msra.mxu1 %v3762_v48 }
 0xdb7   :  { %3098 = vmatprep.subr.mxu1 %v3522_v5 }
 0xdb8   :  { %3099 = vmatpush3.msra.mxu1 %v3771_v49 }
 0xdb9   :  { %3100 = vmatprep.subr.mxu1 %v3522_v5 }
 0xdba   :  { %3101 = vmatpush3.msra.mxu1 %v3778_v50 }
 0xdbb   :  { %3103 = vmatmul.mubr.msk.f32.vlgmr.msra.gmra.mxu1 %vm281_vm3, %v1492_v12  ;;  %3116 = vmatprep.subr.mxu1 %v3522_v5 }
 0xdbc   :  { %3117 = vmatpush3.msra.mxu1 %v3714_v36  ;;  %3124 = vmatprep.mubr.msk.f32.mxu1 %vm3523_vm2, %v3522_v5 }
 0xdbd   :  { %3118 = vmatprep.subr.mxu1 %v3522_v5 }
 0xdbe   :  { %3119 = vmatpush3.msra.mxu1 %v3722_v39 }
 0xdbf   :  { %3120 = vmatprep.subr.mxu1 %v3522_v5 }
 0xdc0   :  { %3121 = vmatpush3.msra.mxu1 %v3731_v41 }
 0xdc1   :  { %3122 = vmatprep.subr.mxu1 %v3522_v5 }
 0xdc2   :  { %v1484_v15 = vpop.permute.xlu1 %1483  ;;  %3123 = vmatpush3.msra.mxu1 %v3737_v42 }
 0xdc3   :  { %1487 = vst.msk [vmem:[#allocation3 + $0x18] sm:$0xff] %vm281_vm3, %v1484_v15  ;;  %3092 = vmatmul.mubr.msk.f32.vlgmr.msra.gmra.mxu0 %vm281_vm3, %v1484_v15  ;;  %3138 = vmatprep.subr.mxu1 %v3522_v5 }
 0xdc4   :  { %3106 = vmatpush3.msra.mxu0 %v3632_v3  ;;  %3113 = vmatprep.mubr.msk.f32.mxu0 %vm3523_vm2, %v3522_v5  ;;  %v234_v3 = vadd.f32 %v3692_v13, %v3703_v18 }
 0xdc5   :  { %3107 = vmatprep.subr.mxu0 %v3522_v5 }
 0xdc6   :  { %3108 = vmatpush3.msra.mxu0 %v3652_v8 }
 0xdc7   :  { %3109 = vmatprep.subr.mxu0 %v3522_v5 }
 0xdc8   :  { %3110 = vmatpush3.msra.mxu0 %v3664_v10 }
 0xdc9   :  { %3111 = vmatprep.subr.mxu0 %v3522_v5 }
 0xdca   :  { %3112 = vmatpush3.msra.mxu0 %v3673_v11 }
 0xdcb   :  { %3127 = vmatprep.subr.mxu0 %v3522_v5 }
 0xe73   :  { %v1561_v17 = vpop.f32.mrf.mxu1 }
 0xe74   :  { %v1565_v20 = vadd.f32 %v1561_v17, %v234_v3 }
 0xe75   :  { %v3082_v21 = vpop.f32.mrf.mxu1 }
 0xe76   :  { %3300 = vtanh.f32 %v1565_v20  ;;  %v2748_v28 = vmul.f32 -1.442695, %v1565_v20 }
 0xe7b   :  { %v1728_v22 = vpop.f32.mrf.mxu1 }
 0xe7d   :  { %v3104_v23 = vpop.f32.mrf.mxu1 }
 0xe83   :  { %v3301_v8 = vpop.eup %3300  ;;  %v1658_v24 = vpop.f32.mrf.mxu0 }
 0xe84   :  { %v1729_v25 = vadd.f32 %v1728_v22, %v1658_v24  ;;  %1575 = vrot.lane.b32.xlu0 %v3301_v8, %s3524_s25 }
 0xe85   :  { %v3093_v10 = vpop.f32.mrf.mxu0 }
 0xe86   :  { %v1732_v26 = vadd.f32 %v3804_v59, %v1729_v25 }
 0xe88   :  { %3302 = vtanh.f32 %v1732_v26  ;;  %v2751_v18 = vmul.f32 -1.442695, %v1732_v26 }
 0xe89   :  { %3304 = vpow2.f32 %v2748_v28 }
 0xe8a   :  { %3306 = vpow2.f32 %v2751_v18 }
 0xe95   :  { %v3303_v11 = vpop.eup %3302 }
 0xe96   :  { %1742 = vrot.lane.b32.xlu1 %v3303_v11, %s3524_s25  ;;  %v3305_v13 = vpop.eup %3304 }
 0xe97   :  { %v1569_v29 = vadd.f32 1.0, %v3305_v13  ;;  %v3307_v27 = vpop.eup %3306 }
 0xe98   :  { %v1736_v33 = vadd.f32 1.0, %v3307_v27 }
 0xe99   :  { %3308 = vrcp.f32 %v1569_v29 }
 0xe9a   :  { %3310 = vrcp.f32 %v1736_v33 }
 0xea6   :  { %v3309_v30 = vpop.eup %3308 }
 0xea7   :  { %v3311_v34 = vpop.eup %3310  ;;  %v1573_v38 = vmul.f32 %v3309_v30, %v3971_v62 }
 0xea8   :  { %v1740_v44 = vmul.f32 %v3311_v34, %v3975_v1 }
 0xef6   :  { %v1576_v32 = vpop.permute.xlu0 %1575 }
 0xef7   :  { %v1578_v31 = vmul.f32 %v3309_v30, %v1576_v32 }
 0xef9   :  { %1580 = vrot.lane.b32.xlu0 %v1578_v31, %s3524_s25 }
 0xf08   :  { %v1743_v35 = vpop.permute.xlu1 %1742 }
 0xf09   :  { %v1745_v37 = vmul.f32 %v3311_v34, %v1743_v35 }
 0xf0b   :  { %1747 = vrot.lane.b32.xlu1 %v1745_v37, %s3524_s25  ;;  %v3381_v37 = vld [vmem:[#allocation9 + $0x18] sm:$0xff] }
 0xf6b   :  { %v1581_v40 = vpop.permute.xlu0 %1580 }
 0xf6c   :  { %v4024_v43 = vadd.f32 %v1581_v40, %v1573_v38  ;;  %v3382_v38 = vld [vmem:[#allocation9 + $0x10] sm:$0xff]  ;;  %v3383_v40 = vld [vmem:[#allocation9 + $0x8] sm:$0xff] }
 0xf6e   :  { %3312 = vtanh.f32 %v4024_v43 }
 0xf7b   :  { %v3313_v14 = vpop.eup %3312 }
 0xf7c   :  { %1586 = vrot.lane.b32.xlu0 %v3313_v14, %s3524_s25  ;;  %v244_v14 = vadd.f32 %v4080_v60, %v3698_v16 }
 0xf7d   :  { %v1748_v45 = vpop.permute.xlu1 %1747 }
 0xf7e   :  { %v4029_v47 = vadd.f32 %v1748_v45, %v1740_v44 }
 0xf80   :  { %3314 = vtanh.f32 %v4029_v47 }
 0xf8d   :  { %v3315_v53 = vpop.eup %3314 }
 0xf8e   :  { %1753 = vrot.lane.b32.xlu1 %v3315_v53, %s3524_s25 }
 0xfee   :  { %v1587_v54 = vpop.permute.xlu0 %1586 }
 0xfef   :  { %v1589_v55 = vmul.f32 %v3309_v30, %v1587_v54 }
 0xff1   :  { %1766 = vrot.lane.b32.xlu0 %v1589_v55, %s3525_s0 }
0x1000   :  { %v1754_v56 = vpop.permute.xlu1 %1753 }
0x1001   :  { %v1756_v51 = vmul.f32 %v3311_v34, %v1754_v56 }
0x1003   :  { %1758 = vrot.lane.b32.xlu1 %v1756_v51, %s3525_s0 }
0x1063   :  { %v1767_v57 = vpop.permute.xlu0 %1766 }
0x1064   :  { %3114 = vmatmul.mubr.msk.f32.vlgmr.msra.gmra.mxu0 %vm281_vm3, %v1767_v57 }
0x1065   :  { %3128 = vmatpush3.msra.mxu0 %v3756_v46  ;;  %3135 = vmatprep.mubr.msk.f32.mxu0 %vm3523_vm2, %v3522_v5 }
0x1066   :  { %3129 = vmatprep.subr.mxu0 %v3522_v5 }
0x1067   :  { %3130 = vmatpush3.msra.mxu0 %v3762_v48 }
0x1068   :  { %3131 = vmatprep.subr.mxu0 %v3522_v5 }
0x1069   :  { %3132 = vmatpush3.msra.mxu0 %v3771_v49 }
0x106a   :  { %3133 = vmatprep.subr.mxu0 %v3522_v5 }
0x106b   :  { %3134 = vmatpush3.msra.mxu0 %v3778_v50 }
0x106c   :  { %3136 = vmatmul.mubr.msk.f32.vlgmr.msra.gmra.mxu0 %vm281_vm3, %v1767_v57  ;;  %3149 = vmatprep.subr.mxu0 %v3522_v5 }
0x106d   :  { %3150 = vmatpush3.msra.mxu0 %v3714_v36  ;;  %3157 = vmatprep.mubr.msk.f32.mxu0 %vm3523_vm2, %v3522_v5  ;;  %v3372_v36 = vld [vmem:[%s4213_s4 + $0x18] sm:$0xff] }
0x106e   :  { %3151 = vmatprep.subr.mxu0 %v3522_v5 }
0x106f   :  { %3152 = vmatpush3.msra.mxu0 %v3722_v39  ;;  %v3373_v39 = vld [vmem:[%s4213_s4 + $0x10] sm:$0xff] }
0x1070   :  { %3153 = vmatprep.subr.mxu0 %v3522_v5 }
0x1071   :  { %3154 = vmatpush3.msra.mxu0 %v3731_v41  ;;  %v3374_v41 = vld [vmem:[%s4213_s4 + $0x8] sm:$0xff] }
0x1072   :  { %3155 = vmatprep.subr.mxu0 %v3522_v5 }
0x1073   :  { %3156 = vmatpush3.msra.mxu0 %v3737_v42  ;;  %v3375_v42 = vld [vmem:[%s4213_s4] sm:$0xff] }
0x1074   :  { %3171 = vmatprep.subr.mxu0 %v3522_v5 }
0x1075   :  { %v1759_v58 = vpop.permute.xlu1 %1758 }
0x1076   :  { %1762 = vst.msk [vmem:[#allocation3 + $0x20] sm:$0xff] %vm281_vm3, %v1759_v58  ;;  %3125 = vmatmul.mubr.msk.f32.vlgmr.msra.gmra.mxu1 %vm281_vm3, %v1759_v58 }
0x1077   :  { %3139 = vmatpush3.msra.mxu1 %v3372_v36  ;;  %3146 = vmatprep.mubr.msk.f32.mxu1 %vm3523_vm2, %v3522_v5 }
0x1078   :  { %3140 = vmatprep.subr.mxu1 %v3522_v5 }
0x1079   :  { %3141 = vmatpush3.msra.mxu1 %v3373_v39 }
0x107a   :  { %3142 = vmatprep.subr.mxu1 %v3522_v5 }
0x107b   :  { %3143 = vmatpush3.msra.mxu1 %v3374_v41 }
0x107c   :  { %3144 = vmatprep.subr.mxu1 %v3522_v5 }
0x107d   :  { %3145 = vmatpush3.msra.mxu1 %v3375_v42 }
0x107e   :  { %3160 = vmatprep.subr.mxu1 %v3522_v5 }
0x1124   :  { %v1836_v62 = vpop.f32.mrf.mxu0 }
0x1125   :  { %v1840_v63 = vadd.f32 %v1836_v62, %v239_v61 }
0x1126   :  { %v3115_v52 = vpop.f32.mrf.mxu0 }
0x1127   :  { %3316 = vtanh.f32 %v1840_v63  ;;  %v2753_v15 = vmul.f32 -1.442695, %v1840_v63 }
0x112c   :  { %v2003_v0 = vpop.f32.mrf.mxu0 }
0x112e   :  { %v3137_v1 = vpop.f32.mrf.mxu0 }
0x1134   :  { %v3317_v2 = vpop.eup %3316 }
0x1135   :  { %1850 = vrot.lane.b32.xlu0 %v3317_v2, %s3524_s25 }
0x1136   :  { %v1933_v4 = vpop.f32.mrf.mxu1 }
0x1137   :  { %v2004_v6 = vadd.f32 %v2003_v0, %v1933_v4 }
0x1138   :  { %v3126_v7 = vpop.f32.mrf.mxu1 }
0x1139   :  { %v2007_v9 = vadd.f32 %v3804_v59, %v2004_v6 }
0x113b   :  { %3318 = vtanh.f32 %v2007_v9  ;;  %v2756_v17 = vmul.f32 -1.442695, %v2007_v9 }
0x113c   :  { %3320 = vpow2.f32 %v2753_v15 }
0x1148   :  { %v3319_v12 = vpop.eup %3318 }
0x1149   :  { %2017 = vrot.lane.b32.xlu1 %v3319_v12, %s3524_s25  ;;  %v3321_v19 = vpop.eup %3320 }
0x114a   :  { %v1844_v3 = vadd.f32 1.0, %v3321_v19 }
0x114c   :  { %3322 = vrcp.f32 %v1844_v3 }
0x114d   :  { %3324 = vpow2.f32 %v2756_v17  ;;  %v2502_v17 = vld [vmem:[#allocation10 + $0x18] sm:$0xff] }
0x1159   :  { %v3323_v20 = vpop.eup %3322 }
0x115a   :  { %v3325_v22 = vpop.eup %3324  ;;  %v1848_v10 = vmul.f32 %v3323_v20, %v4024_v43  ;;  %v3384_v43 = vld [vmem:[#allocation9] sm:$0xff] }
0x115b   :  { %v2011_v8 = vadd.f32 1.0, %v3325_v22 }
0x115d   :  { %3326 = vrcp.f32 %v2011_v8 }
0x116a   :  { %v3327_v59 = vpop.eup %3326 }
0x116b   :  { %v2015_v13 = vmul.f32 %v3327_v59, %v4029_v47 }
0x11a7   :  { %v1851_v21 = vpop.permute.xlu0 %1850 }
0x11a8   :  { %v1853_v23 = vmul.f32 %v3323_v20, %v1851_v21 }
0x11aa   :  { %1855 = vrot.lane.b32.xlu0 %v1853_v23, %s3524_s25 }
0x11bb   :  { %v2018_v24 = vpop.permute.xlu1 %2017 }
0x11bc   :  { %v2020_v25 = vmul.f32 %v3327_v59, %v2018_v24  ;;  %v2501_v24 = vld [vmem:[#allocation10 + $0x10] sm:$0xff] }
0x11be   :  { %2022 = vrot.lane.b32.xlu1 %v2020_v25, %s3524_s25  ;;  %v2491_v25 = vld [vmem:[#allocation3] sm:$0xff] }
0x121c   :  { %v1856_v26 = vpop.permute.xlu0 %1855 }
0x121d   :  { %v4090_v11 = vadd.f32 %v1856_v26, %v1848_v10  ;;  %v2500_v10 = vld [vmem:[#allocation10 + $0x8] sm:$0xff]  ;;  %v2499_v26 = vld [vmem:[#allocation10] sm:$0xff] }
0x121f   :  { %3328 = vtanh.f32 %v4090_v11 }
0x122c   :  { %v3329_v28 = vpop.eup %3328 }
0x122d   :  { %1861 = vrot.lane.b32.xlu0 %v3329_v28, %s3524_s25  ;;  %v2493_v28 = vld [vmem:[#allocation3 + $0x10] sm:$0xff] }
0x1230   :  { %v2023_v18 = vpop.permute.xlu1 %2022 }
0x1231   :  { %v4095_v29 = vadd.f32 %v2023_v18, %v2015_v13  ;;  %v2494_v13 = vld [vmem:[#allocation3 + $0x18] sm:$0xff]  ;;  %v2495_v18 = vld [vmem:[#allocation3 + $0x20] sm:$0xff] }
0x1233   :  { %3330 = vtanh.f32 %v4095_v29 }
0x1240   :  { %v3331_v27 = vpop.eup %3330 }
0x1241   :  { %2028 = vrot.lane.b32.xlu1 %v3331_v27, %s3524_s25 }
0x129f   :  { %v1862_v30 = vpop.permute.xlu0 %1861 }
0x12a0   :  { %v1864_v32 = vmul.f32 %v3323_v20, %v1862_v30 }
0x12a2   :  { %2041 = vrot.lane.b32.xlu0 %v1864_v32, %s3525_s0 }
0x12b3   :  { %v2029_v31 = vpop.permute.xlu1 %2028 }
0x12b4   :  { %v2031_v33 = vmul.f32 %v3327_v59, %v2029_v31 }
0x12b6   :  { %2033 = vrot.lane.b32.xlu1 %v2031_v33, %s3525_s0 }
0x1314   :  { %v2042_v34 = vpop.permute.xlu0 %2041 }
0x1315   :  { %3147 = vmatmul.mubr.msk.f32.vlgmr.msra.gmra.mxu1 %vm281_vm3, %v2042_v34 }
0x1316   :  { %3161 = vmatpush3.msra.mxu1 %v3756_v46  ;;  %3168 = vmatprep.mubr.msk.f32.mxu1 %vm3523_vm2, %v3522_v5  ;;  %v3377_v46 = vld [vmem:[%s4215_s6 + $0x18] sm:$0xff] }
0x1317   :  { %3162 = vmatprep.subr.mxu1 %v3522_v5 }
0x1318   :  { %3163 = vmatpush3.msra.mxu1 %v3762_v48  ;;  %v3378_v48 = vld [vmem:[%s4215_s6 + $0x10] sm:$0xff] }
0x1319   :  { %3164 = vmatprep.subr.mxu1 %v3522_v5 }
0x131a   :  { %3165 = vmatpush3.msra.mxu1 %v3771_v49  ;;  %v3379_v49 = vld [vmem:[%s4215_s6 + $0x8] sm:$0xff] }
0x131b   :  { %3166 = vmatprep.subr.mxu1 %v3522_v5 }
0x131c   :  { %3167 = vmatpush3.msra.mxu1 %v3778_v50  ;;  %v3380_v50 = vld [vmem:[%s4215_s6] sm:$0xff] }
0x131d   :  { %3169 = vmatmul.mubr.msk.f32.vlgmr.msra.gmra.mxu1 %vm281_vm3, %v2042_v34  ;;  %3182 = vmatprep.subr.mxu1 %v3522_v5 }
0x131e   :  { %3183 = vmatpush3.msra.mxu1 %v3377_v46  ;;  %3190 = vmatprep.mubr.msk.f32.mxu1 %vm3523_vm2, %v3522_v5 }
0x131f   :  { %3184 = vmatprep.subr.mxu1 %v3522_v5 }
0x1320   :  { %3185 = vmatpush3.msra.mxu1 %v3378_v48  ;;  %v4178_v48 = vld [vmem:[%s4219_s10] ss:$0 sm:$0xff]  ;;  %s3526_s10 = smov 96  }
0x1321   :  { %3186 = vmatprep.subr.mxu1 %v3522_v5 }
0x1322   :  { %3187 = vmatpush3.msra.mxu1 %v3379_v49 }
0x1323   :  { %3188 = vmatprep.subr.mxu1 %v3522_v5 }
0x1324   :  { %3189 = vmatpush3.msra.mxu1 %v3380_v50 }
0x1328   :  { %v2034_v35 = vpop.permute.xlu1 %2033 }
0x1329   :  { %2037 = vst.msk [vmem:[#allocation3 + $0x28] sm:$0xff] %vm281_vm3, %v2034_v35  ;;  %3158 = vmatmul.mubr.msk.f32.vlgmr.msra.gmra.mxu0 %vm281_vm3, %v2034_v35 }
0x132a   :  { %3172 = vmatpush3.msra.mxu0 %v3381_v37  ;;  %3179 = vmatprep.mubr.msk.f32.mxu0 %vm3523_vm2, %v3522_v5 }
0x132b   :  { %3173 = vmatprep.subr.mxu0 %v3522_v5 }
0x132c   :  { %3174 = vmatpush3.msra.mxu0 %v3382_v38 }
0x132d   :  { %3175 = vmatprep.subr.mxu0 %v3522_v5 }
0x132e   :  { %3176 = vmatpush3.msra.mxu0 %v3383_v40 }
0x132f   :  { %3177 = vmatprep.subr.mxu0 %v3522_v5  ;;  %v4143_v5 = vld [vmem:[%s4217_s8] ss:$0 sm:$0xff] }
0x1330   :  { %3178 = vmatpush3.msra.mxu0 %v3384_v43 }
0x1331   :  { %3193 = vmatprep.subr.mxu0 %v2502_v17 }
0x13d5   :  { %v2111_v44 = vpop.f32.mrf.mxu1 }
0x13d6   :  { %v2115_v45 = vadd.f32 %v2111_v44, %v244_v14 }
0x13d7   :  { %v3148_v47 = vpop.f32.mrf.mxu1 }
0x13d8   :  { %3332 = vtanh.f32 %v2115_v45  ;;  %v2758_v36 = vmul.f32 -1.442695, %v2115_v45 }
0x13dd   :  { %v2278_v53 = vpop.f32.mrf.mxu1 }
0x13df   :  { %v3170_v54 = vpop.f32.mrf.mxu1 }
0x13e5   :  { %v3333_v55 = vpop.eup %3332 }
0x13e6   :  { %2125 = vrot.lane.b32.xlu0 %v3333_v55, %s3524_s25 }
0x13e9   :  { %v2208_v56 = vpop.f32.mrf.mxu0 }
0x13ea   :  { %v2279_v51 = vadd.f32 %v2278_v53, %v2208_v56 }
0x13eb   :  { %v3159_v57 = vpop.f32.mrf.mxu0 }
0x13ec   :  { %v2282_v58 = vadd.f32 %v4143_v5, %v2279_v51 }
0x13ee   :  { %3334 = vtanh.f32 %v2282_v58  ;;  %v2761_v42 = vmul.f32 -1.442695, %v2282_v58 }
0x13ef   :  { %3336 = vpow2.f32 %v2758_v36 }
0x13fb   :  { %v3335_v16 = vpop.eup %3334 }
0x13fc   :  { %2292 = vrot.lane.b32.xlu1 %v3335_v16, %s3524_s25  ;;  %v3337_v39 = vpop.eup %3336 }
0x13fd   :  { %v2119_v41 = vadd.f32 1.0, %v3337_v39 }
0x13ff   :  { %3338 = vrcp.f32 %v2119_v41 }
0x1400   :  { %3340 = vpow2.f32 %v2761_v42 }
0x140c   :  { %v3339_v60 = vpop.eup %3338 }
0x140d   :  { %v3341_v63 = vpop.eup %3340  ;;  %v2123_v4 = vmul.f32 %v3339_v60, %v4090_v11  ;;  %v2492_v11 = vld [vmem:[#allocation3 + $0x8] sm:$0xff] }
0x140e   :  { %v2286_v52 = vadd.f32 1.0, %v3341_v63 }
0x1410   :  { %3342 = vrcp.f32 %v2286_v52 }
0x141d   :  { %v3343_v0 = vpop.eup %3342 }
0x141e   :  { %v2290_v12 = vmul.f32 %v3343_v0, %v4095_v29  ;;  %v2496_v29 = vld [vmem:[#allocation3 + $0x28] sm:$0xff] }
0x1458   :  { %v2126_v61 = vpop.permute.xlu0 %2125 }
0x1459   :  { %v2128_v62 = vmul.f32 %v3339_v60, %v2126_v61 }
0x145b   :  { %2130 = vrot.lane.b32.xlu0 %v2128_v62, %s3524_s25 }
0x146e   :  { %v2293_v1 = vpop.permute.xlu1 %2292 }
0x146f   :  { %v2295_v2 = vmul.f32 %v3343_v0, %v2293_v1 }
0x1471   :  { %2297 = vrot.lane.b32.xlu1 %v2295_v2, %s3524_s25 }
0x14cd   :  { %v2131_v6 = vpop.permute.xlu0 %2130 }
0x14ce   :  { %v4150_v7 = vadd.f32 %v2131_v6, %v2123_v4 }
0x14d0   :  { %3344 = vtanh.f32 %v4150_v7 }
0x14dd   :  { %v3345_v9 = vpop.eup %3344 }
0x14de   :  { %2136 = vrot.lane.b32.xlu0 %v3345_v9, %s3524_s25 }
0x14e3   :  { %v2298_v15 = vpop.permute.xlu1 %2297 }
0x14e4   :  { %v4155_v19 = vadd.f32 %v2298_v15, %v2290_v12 }
0x14e6   :  { %3346 = vtanh.f32 %v4155_v19 }
0x14f3   :  { %v3347_v3 = vpop.eup %3346 }
0x14f4   :  { %2303 = vrot.lane.b32.xlu1 %v3347_v3, %s3524_s25 }
0x1550   :  { %v2137_v20 = vpop.permute.xlu0 %2136 }
0x1551   :  { %v2139_v21 = vmul.f32 %v3339_v60, %v2137_v20 }
0x1553   :  { %2386 = vrot.lane.b32.xlu1 %v2139_v21, %s3525_s0 }
0x1566   :  { %v2304_v22 = vpop.permute.xlu1 %2303 }
0x1567   :  { %v2306_v23 = vmul.f32 %v3343_v0, %v2304_v22 }
0x1569   :  { %2308 = vrot.lane.b32.xlu0 %v2306_v23, %s3525_s0 }
0x15c5   :  { %v4161_v8 = vpop.permute.xlu1 %2386 }
0x15c6   :  { %3191 = vmatmul.mubr.msk.f32.vlgmr.msra.gmra.mxu1 %vm281_vm3, %v4161_v8 }
0x15db   :  { %v2309_v59 = vpop.permute.xlu0 %2308 }
0x15dc   :  { %2312 = vst.msk [vmem:[#allocation3 + $0x30] sm:$0xff] %vm281_vm3, %v2309_v59  ;;  %3180 = vmatmul.mubr.msk.f32.vlgmr.msra.gmra.mxu0 %vm281_vm3, %v2309_v59 }
0x15dd   :  { %3194 = vmatpush3.msra.mxu0 %v2502_v17  ;;  %3201 = vmatprep.mubr.msk.f32.mxu0 %vm281_vm3, %v2491_v25 }
0x15de   :  { %3195 = vmatprep.subr.mxu0 %v2501_v24 }
0x15df   :  { %3196 = vmatpush3.msra.mxu0 %v2501_v24 }
0x15e0   :  { %3197 = vmatprep.subr.mxu0 %v2500_v10 }
0x15e1   :  { %3198 = vmatpush3.msra.mxu0 %v2500_v10 }
0x15e2   :  { %3199 = vmatprep.subr.mxu0 %v2499_v26 }
0x15e3   :  { %3200 = vmatpush3.msra.mxu0 %v2499_v26  ;;  %v2497_v27 = vld [vmem:[#allocation3 + $0x30] sm:$0xff] }
0x15e4   :  { %3202 = vmatmul.mubr.msk.f32.vlgmr.msra.gmra.mxu0 %vm281_vm3, %v2492_v11 }
0x15e5   :  { %3204 = vmatprep.mubr.msk.f32.mxu0 %vm281_vm3, %v2493_v28 }
0x15e8   :  { %3205 = vmatmul.mubr.msk.f32.gmra.mxu0 %vm281_vm3, %v2494_v13 }
0x15e9   :  { %3207 = vmatprep.mubr.msk.f32.mxu0 %vm281_vm3, %v2495_v18 }
0x15ec   :  { %3208 = vmatmul.mubr.msk.f32.gmra.mxu0 %vm281_vm3, %v2496_v29 }
0x15ed   :  { %3210 = vmatprep.mubr.msk.f32.mxu0 %vm281_vm3, %v2497_v27 }
0x1686   :  { %v2456_v30 = vpop.f32.mrf.mxu1 }
0x1688   :  { %v3192_v32 = vpop.f32.mrf.mxu1 }
0x169c   :  { %v2381_v31 = vpop.f32.mrf.mxu0 }
0x169d   :  { %v2457_v33 = vadd.f32 %v2456_v30, %v2381_v31 }
0x169e   :  { %v3181_v34 = vpop.f32.mrf.mxu0 }
0x169f   :  { %v2460_v46 = vadd.f32 %v4143_v5, %v2457_v33 }
0x16a1   :  { %3348 = vtanh.f32 %v2460_v46  ;;  %v2764_v61 = vmul.f32 -1.442695, %v2460_v46 }
0x16a4   :  { %v3203_v49 = vpop.f32.mrf.mxu0 }
0x16a5   :  { %v2606_v50 = vadd.f32 %v3203_v49, %v4178_v48 }
0x16a6   :  { %v2600_v35 = vpop.f32.mrf.mxu0 }
0x16a7   :  { %3350 = vtanh.f32 %v2606_v50  ;;  %v2601_v37 = vadd.f32 %v4178_v48, %v2600_v35 }
0x16a8   :  { %v3206_v38 = vpop.f32.mrf.mxu0 }
0x16a9   :  { %3352 = vtanh.f32 %v2601_v37  ;;  %v2616_v40 = vadd.f32 %v3206_v38, %v4178_v48 }
0x16aa   :  { %v2610_v43 = vpop.f32.mrf.mxu0 }
0x16ab   :  { %3354 = vtanh.f32 %v2616_v40  ;;  %v2611_v14 = vadd.f32 %v4178_v48, %v2610_v43 }
0x16ac   :  { %v3209_v44 = vpop.f32.mrf.mxu0 }
0x16ad   :  { %3356 = vtanh.f32 %v2611_v14  ;;  %v2626_v45 = vadd.f32 %v3209_v44, %v4178_v48 }
0x16ae   :  { %v3349_v47 = vpop.eup %3348  ;;  %v2620_v53 = vpop.f32.mrf.mxu0 }
0x16af   :  { %3358 = vtanh.f32 %v2626_v45  ;;  %v2621_v54 = vadd.f32 %v4178_v48, %v2620_v53  ;;  %2470 = vrot.lane.b32.xlu0 %v3349_v47, %s3524_s25 }
0x16b1   :  { %3360 = vtanh.f32 %v2621_v54 }
0x16b2   :  { %3362 = vpow2.f32 %v2764_v61 }
0x16b4   :  { %v3351_v55 = vpop.eup %3350 }
0x16b5   :  { %v2648_v56 = vmul.f32 80.0, %v3351_v55 }
0x16b6   :  { %v3353_v51 = vpop.eup %3352 }
0x16b7   :  { %2656 = vst [vmem:[#allocation12 + $0x8] sm:$0xff] %v2648_v56  ;;  %v2647_v57 = vmul.f32 80.0, %v3353_v51 }
0x16b8   :  { %v3355_v5 = vpop.eup %3354 }
0x16b9   :  { %2655 = vst [vmem:[#allocation12] sm:$0xff] %v2647_v57  ;;  %v2650_v58 = vmul.f32 80.0, %v3355_v5 }
0x16ba   :  { %v3357_v16 = vpop.eup %3356 }
0x16bb   :  { %2658 = vst [vmem:[#allocation12 + $0x18] sm:$0xff] %v2650_v58  ;;  %v2649_v36 = vmul.f32 80.0, %v3357_v16 }
0x16bc   :  { %v3359_v39 = vpop.eup %3358 }
0x16bd   :  { %2657 = vst [vmem:[#allocation12 + $0x10] sm:$0xff] %v2649_v36  ;;  %v2652_v41 = vmul.f32 80.0, %v3359_v39 }
0x16be   :  { %v3361_v42 = vpop.eup %3360 }
0x16bf   :  { %2660 = vst [vmem:[#allocation12 + $0x28] sm:$0xff] %v2652_v41  ;;  %v2651_v60 = vmul.f32 80.0, %v3361_v42  ;;  %v3363_v62 = vpop.eup %3362 }
0x16c0   :  { %v2464_v63 = vadd.f32 1.0, %v3363_v62 }
0x16c1   :  { %2659 = vst [vmem:[#allocation12 + $0x20] sm:$0xff] %v2651_v60 }
0x16c2   :  { %3364 = vrcp.f32 %v2464_v63 }
0x16cf   :  { %v3365_v52 = vpop.eup %3364 }
0x16d0   :  { %v2468_v2 = vmul.f32 %v3365_v52, %v4155_v19 }
0x1721   :  { %v2471_v0 = vpop.permute.xlu0 %2470 }
0x1722   :  { %v2473_v1 = vmul.f32 %v3365_v52, %v2471_v0 }
0x1724   :  { %2475 = vrot.lane.b32.xlu1 %v2473_v1, %s3524_s25 }
0x1796   :  { %v2476_v4 = vpop.permute.xlu1 %2475 }
0x1797   :  { %v2478_v6 = vadd.f32 %v2476_v4, %v2468_v2 }
0x1799   :  { %3366 = vtanh.f32 %v2478_v6 }
0x17a6   :  { %v3367_v9 = vpop.eup %3366 }
0x17a7   :  { %2481 = vrot.lane.b32.xlu0 %v3367_v9, %s3524_s25 }
0x1819   :  { %v2482_v12 = vpop.permute.xlu0 %2481 }
0x181a   :  { %v2484_v15 = vmul.f32 %v3365_v52, %v2482_v12 }
0x181c   :  { %2664 = vrot.lane.b32.xlu0 %v2484_v15, %s3526_s10  ;;  %2486 = vrot.lane.b32.xlu1 %v2484_v15, %s3525_s0 }
0x1820   :  { %2672 = vrot.lane.b32.xlu0 %v2478_v6, %s3525_s0  ;;  %2668 = vrot.lane.b32.xlu1 %v4150_v7, %s3524_s25  ;;  %s3527_s0 = smov [#allocation13]  }
0x1821   :  { %s2699_s19 = sshll.u32 %s3527_s0, 4  ;;  %s2700_s19 = int_to_ptr.vmem [resolvable:$true] %s2699_s19 }
0x1822   :  { %s3466_s25 = scalar_lea.vmem %s2700_s19, 128  ;;  %p3471_p7 = scmp.lt.s32.totalorder %s2700_s19, %s2700_s19 }
0x1823   :  { %p3467_p6 = scmp.ne.s32.totalorder %s2700_s19, %s3466_s25  ;;  %p3472_p8 = scmp.lt.s32.totalorder %s3466_s25, %s3466_s25 }
0x1825   :  { %p3473_p9 = por %p3472_p8, %p3471_p7 }
0x1827   :  { %p3474_p10 = pnand %p3473_p9, %p3467_p6 }
0x188e   :  { %v2665_v3 = vpop.permute.xlu0 %2664  ;;  %v2487_v17 = vpop.permute.xlu1 %2486 }
0x188f   :  { %2490 = vst.msk [vmem:[#allocation3 + $0x38] sm:$0xff] %vm281_vm3, %v2487_v17  ;;  %v2675_v19 = vsel %vm281_vm3, %v4161_v8, %v2665_v3 }
0x1892   :  { %v2673_v20 = vpop.permute.xlu0 %2672  ;;  %v2669_v21 = vpop.permute.xlu1 %2668 }
0x1893   :  { %v2677_v22 = vsel %vm2676_vm4, %v2675_v19, %v2669_v21 }
0x1894   :  { %v2679_v23 = vsel %vm2678_vm5, %v2677_v22, %v2673_v20 }
0x1895   :  { %2680 = vst [vmem:[#allocation13] sm:$0xff] %v2679_v23 }
0x1896   :  { %v2498_v59 = vld [vmem:[#allocation3 + $0x38] sm:$0xff] }
0x1897   :  { %3211 = vmatmul.mubr.msk.f32.gmra.mxu0 %vm281_vm3, %v2498_v59 }
0x1898   :  { %3477 = shalt.err (!%p3474_p10)
}
0x1899   :  { %2702 = dma.vmem_to_hbm [thread:$0]  %s2700_s19, 128, %s4221_s12, [#allocation14]  }
0x189a   :  { %s3528_s21 = smov [#allocation12]  }
0x189b   :  { %s2686_s22 = sshll.u32 %s3528_s21, 4  ;;  %s2687_s22 = int_to_ptr.vmem [resolvable:$true] %s2686_s22 }
0x189c   :  { %s3486_s7 = scalar_lea.vmem %s2687_s22, 1024  ;;  %p3491_p12 = scmp.lt.s32.totalorder %s2687_s22, %s2687_s22 }
0x189d   :  { %p3487_p11 = scmp.ne.s32.totalorder %s2687_s22, %s3486_s7  ;;  %p3492_p13 = scmp.lt.s32.totalorder %s3486_s7, %s3486_s7 }
0x189f   :  { %p3493_p0 = por %p3492_p13, %p3491_p12 }
0x18a1   :  { %p3494_p1 = pnand %p3493_p0, %p3487_p11 }
0x1957   :  { %v3212_v7 = vpop.f32.mrf.mxu0 }
0x1958   :  { %v2636_v8 = vadd.f32 %v3212_v7, %v4178_v48 }
0x1959   :  { %v2630_v24 = vpop.f32.mrf.mxu0 }
0x195a   :  { %3368 = vtanh.f32 %v2636_v8  ;;  %v2631_v25 = vadd.f32 %v4178_v48, %v2630_v24 }
0x195c   :  { %3370 = vtanh.f32 %v2631_v25 }
0x1967   :  { %v3369_v10 = vpop.eup %3368 }
0x1968   :  { %v2654_v26 = vmul.f32 80.0, %v3369_v10 }
0x1969   :  { %v3371_v11 = vpop.eup %3370 }
0x196a   :  { %2662 = vst [vmem:[#allocation12 + $0x38] sm:$0xff] %v2654_v26  ;;  %v2653_v28 = vmul.f32 80.0, %v3371_v11 }
0x196c   :  { %2661 = vst [vmem:[#allocation12 + $0x30] sm:$0xff] %v2653_v28 }
0x196d   :  { %3497 = shalt.err (!%p3494_p1)
}
0x196e   :  { %2692 = dma.vmem_to_hbm [thread:$0]  %s2687_s22, 1024, %s4220_s11, [#allocation6], %s3518_s26, %s3518_s26, %s3519_s27  }
0x196f   :  { %3512 = dma.done.wait [#allocation6], 1024  }
0x1970   :  { %3513 = vsyncadd [#allocation6], 4294966272 }
0x1971   :  { %3514 = dma.done.wait [#allocation14], 128  }
0x1972   :  { %3515 = vsyncadd [#allocation14], 4294967168 }
0x1973   :  { %2709 = vsyncpa [#allocation5], 1 }
0x1974   :  { %2710 = vsyncpa [#allocation8], 1 }
0x1975   :  { %2711 = vsyncpa [#allocation11], 1 }
0x1976   :  { %2712 = vsyncpa [#allocation6], 1 }
0x1977   :  { %2713 = vsyncpa [#allocation14], 1 }

</bundles_post_ra>
